<compile_context>
chip_gen: v7x
topology: tpu7x:2x2x1
jax: 0.10.0
libtpu: 0.0.40
codegen_flags: <defaults>
</compile_context>

<pallas_src>
import functools

import jax
import jax.numpy as jnp
from jax.experimental import pallas as pl
from jax.experimental.pallas import tpu as pltpu

LN_EPS = 1e-5  # PyTorch nn.LayerNorm default


def _round_up(x, m):
    return ((x + m - 1) // m) * m


def _choose_row_tile(n_rows, requested, quantum=256):
    """Row tile: big (amortise per-step overhead), quantum-aligned, but keep
    >=2 grid steps for megacore when the input spans more than one quantum."""
    requested = max(quantum, _round_up(requested, quantum))
    if n_rows <= quantum:
        # Single full-array block (block_shape == array shape is always legal).
        return max(n_rows, 1)
    if n_rows <= requested:
        # Split into ~2 quantum-aligned tiles so both TensorCores get work.
        half = _round_up(pl.cdiv(n_rows, 2), quantum)
        return min(half, _round_up(n_rows, quantum))
    return requested


def _mlp_ln_kernel(num_linear, out_dims, ln_dim, *refs):
    """refs = (x_ref,                      # (row_tile, f_in)   compute dtype
               w_0, ..., w_{L-1},          # (in_i, out_i)      compute dtype
               vec_ref,                    # (L+2, W) f32: b_0..b_{L-1}, gamma, beta
               o_ref)                      # (row_tile, ln_dim) out dtype
    """
    x_ref = refs[0]
    w_refs = refs[1:1 + num_linear]
    vec_ref = refs[1 + num_linear]
    o_ref = refs[2 + num_linear]

    vecs = vec_ref[...]                       # tiny, read once (f32)
    h = x_ref[...]
    for li in range(num_linear):
        w = w_refs[li][...]
        lhs = h.astype(w.dtype) if h.dtype != w.dtype else h
        b = vecs[li:li + 1, :out_dims[li]]    # (1, out_i) f32 broadcast
        # MXU matmul with f32 accumulation; bias / ReLU on the VPU in f32.
        h = jnp.dot(lhs, w, preferred_element_type=jnp.float32) + b
        if li < num_linear - 1:               # hidden layers: ReLU; output: identity
            h = jnp.maximum(h, 0.0)

    # LayerNorm over the feature axis (biased variance, as in PyTorch), f32.
    gamma = vecs[num_linear:num_linear + 1, :ln_dim]
    beta = vecs[num_linear + 1:num_linear + 2, :ln_dim]
    mean = jnp.mean(h, axis=-1, keepdims=True)
    centered = h - mean
    var = jnp.mean(centered * centered, axis=-1, keepdims=True)
    y = centered * jax.lax.rsqrt(var + LN_EPS) * gamma + beta

    # TODO(synk): ln_dim < 128 lanes -> masked vst; a 128-wide packed output
    # layout would make stores lane-dense, but the kernel is overhead/BW bound.
    o_ref[...] = y.astype(o_ref.dtype)


def _mlp_layernorm(inp, weights, biases, gamma, beta, *,
                   row_tile, compute_dtype, out_dtype):
    """One branch (node OR edge): tiled MLP + LayerNorm in one pallas_call."""
    n_rows, f_in = inp.shape
    num_linear = len(weights)
    out_dims = tuple(int(w.shape[1]) for w in weights)
    ln_dim = out_dims[-1]

    tile = _choose_row_tile(n_rows, row_tile)
    grid = (pl.cdiv(n_rows, tile),)

    x = inp if inp.dtype == compute_dtype else inp.astype(compute_dtype)
    ws = [w.astype(compute_dtype) for w in weights]

    # Pack biases + gamma + beta into one small f32 operand.
    vec_width = max(out_dims)

    def padded_row(v):
        v = v.reshape(-1).astype(jnp.float32)
        return jnp.pad(v, (0, vec_width - v.shape[0]))

    vecs = jnp.stack([padded_row(b) for b in biases]
                     + [padded_row(gamma), padded_row(beta)])

    in_specs = [pl.BlockSpec((tile, f_in), lambda i: (i, 0))]
    for w in ws:                                  # full-array blocks, resident
        in_specs.append(pl.BlockSpec(w.shape, lambda i: (0, 0)))
    in_specs.append(pl.BlockSpec(vecs.shape, lambda i: (0, 0)))
    out_spec = pl.BlockSpec((tile, ln_dim), lambda i: (i, 0))

    # VMEM budget: double-buffered I/O tiles + resident params + slack.
    # Clamp so it is valid on every generation (v7x physical VMEM = 64 MiB).
    in_item = jnp.dtype(compute_dtype).itemsize
    out_item = jnp.dtype(out_dtype).itemsize
    tile_bytes = 2 * tile * f_in * in_item + 2 * tile * ln_dim * out_item
    param_bytes = (sum(int(w.size) for w in ws) * in_item + int(vecs.size) * 4)
    vmem_limit = int(tile_bytes + 2 * param_bytes) + (4 << 20)
    vmem_limit = max(16 << 20, min(vmem_limit, 32 << 20))

    kernel = functools.partial(_mlp_ln_kernel, num_linear, out_dims, ln_dim)

    return pl.pallas_call(
        kernel,
        out_shape=jax.ShapeDtypeStruct((n_rows, ln_dim), out_dtype),
        grid=grid,
        in_specs=in_specs,
        out_specs=out_spec,
        compiler_params=pltpu.CompilerParams(
            dimension_semantics=("parallel",),
            vmem_limit_bytes=vmem_limit),
    )(x, *ws, vecs)


def encoder_forward(x, e, node_params, edge_params, *,
                    row_tile=4096, compute_dtype=jnp.float32,
                    out_dtype=jnp.float32):
    """GNS Encoder forward: (node_mlp(x), edge_mlp(e)).

    x: (num_particles, num_node_features)
    e: (num_edges,     num_edge_features)
    node_params / edge_params: (weights, biases, gamma, beta) with weights
        stored as (in, out).
    """
    node_w, node_b, node_g, node_bt = node_params
    edge_w, edge_b, edge_g, edge_bt = edge_params
    node_out = _mlp_layernorm(x, node_w, node_b, node_g, node_bt,
                              row_tile=row_tile, compute_dtype=compute_dtype,
                              out_dtype=out_dtype)
    edge_out = _mlp_layernorm(e, edge_w, edge_b, edge_g, edge_bt,
                              row_tile=row_tile, compute_dtype=compute_dtype,
                              out_dtype=out_dtype)
    return node_out, edge_out


# ---------------------------------------------------------------------------
# Parameter construction mirroring build_mlp(...) + LayerNorm shapes.
# ---------------------------------------------------------------------------
def init_mlp_params(key, input_size, hidden_layer_sizes, output_size):
    """Deterministic init matching the nn.Linear shapes of build_mlp."""
    layer_sizes = [input_size, *hidden_layer_sizes, output_size]
    weights, biases = [], []
    for i in range(len(layer_sizes) - 1):
        key, wk, bk = jax.random.split(key, 3)
        fan_in, fan_out = layer_sizes[i], layer_sizes[i + 1]
        bound = 1.0 / jnp.sqrt(fan_in)
        # stored as (in, out) so the kernel computes x @ W + b
        weights.append(jax.random.uniform(wk, (fan_in, fan_out), jnp.float32,
                                          -bound, bound))
        biases.append(jax.random.uniform(bk, (fan_out,), jnp.float32,
                                         -bound, bound))
    return weights, biases, key


class EncoderPallas:
    """JAX/Pallas equivalent of the PyTorch `Encoder` module."""

    def __init__(self, key, num_node_features, node_embedding_size,
                 num_edge_features, edge_embedding_size,
                 num_mlp_layers, mlp_layer_size):
        hidden = [mlp_layer_size] * num_mlp_layers
        self.node_w, self.node_b, key = init_mlp_params(
            key, num_node_features, hidden, node_embedding_size)
        self.node_gamma = jnp.ones((node_embedding_size,), jnp.float32)
        self.node_beta = jnp.zeros((node_embedding_size,), jnp.float32)

        self.edge_w, self.edge_b, key = init_mlp_params(
            key, num_edge_features, hidden, edge_embedding_size)
        self.edge_gamma = jnp.ones((edge_embedding_size,), jnp.float32)
        self.edge_beta = jnp.zeros((edge_embedding_size,), jnp.float32)

    def __call__(self, x, e, *, row_tile=4096, compute_dtype=jnp.float32,
                 out_dtype=jnp.float32):
        return encoder_forward(
            x, e,
            (self.node_w, self.node_b, self.node_gamma, self.node_beta),
            (self.edge_w, self.edge_b, self.edge_gamma, self.edge_beta),
            row_tile=row_tile, compute_dtype=compute_dtype,
            out_dtype=out_dtype)


# ---------------------------------------------------------------------------
# Pure-JAX reference for correctness checks.
# ---------------------------------------------------------------------------
def _ref_mlp_layernorm(x, weights, biases, gamma, beta):
    h = x
    for i, (w, b) in enumerate(zip(weights, biases)):
        h = jnp.dot(h, w, preferred_element_type=jnp.float32) + b
        if i < len(weights) - 1:
            h = jnp.maximum(h, 0.0)
    mean = jnp.mean(h, axis=-1, keepdims=True)
    var = jnp.mean((h - mean) ** 2, axis=-1, keepdims=True)
    return (h - mean) / jnp.sqrt(var + LN_EPS) * gamma + beta


if __name__ == "__main__":
    # Small, TPU-friendly shapes consistent with the module.
    num_particles = 128
    num_edges = 256
    num_node_features = 16
    num_edge_features = 8
    node_embedding_size = 32
    edge_embedding_size = 32
    num_mlp_layers = 2
    mlp_layer_size = 64

    key = jax.random.PRNGKey(0)
    key, kx, ke, kp = jax.random.split(key, 4)
    x = jax.random.normal(kx, (num_particles, num_node_features), jnp.float32)
    e = jax.random.normal(ke, (num_edges, num_edge_features), jnp.float32)

    encoder = EncoderPallas(kp, num_node_features, node_embedding_size,
                            num_edge_features, edge_embedding_size,
                            num_mlp_layers, mlp_layer_size)

    fwd = jax.jit(lambda xx, ee: encoder(xx, ee))
    node_out, edge_out = fwd(x, e)
    jax.block_until_ready((node_out, edge_out))

    assert node_out.shape == (num_particles, node_embedding_size)
    assert edge_out.shape == (num_edges, edge_embedding_size)

    # Check against the f32 module semantics (f32 compute path).
    node_ref = _ref_mlp_layernorm(x, encoder.node_w, encoder.node_b,
                                  encoder.node_gamma, encoder.node_beta)
    edge_ref = _ref_mlp_layernorm(e, encoder.edge_w, encoder.edge_b,
                                  encoder.edge_gamma, encoder.edge_beta)
    assert jnp.allclose(node_out, node_ref, atol=1e-2, rtol=1e-2)
    assert jnp.allclose(edge_out, edge_ref, atol=1e-2, rtol=1e-2)
    assert bool(jnp.all(jnp.isfinite(node_out)))
    assert bool(jnp.all(jnp.isfinite(edge_out)))

    print("KERNEL_OK")
</pallas_src>

<mosaic_0001>
module attributes {stable_mosaic.version = 11 : i64} {
  func.func @_mlp_ln_kernel(%arg0: i32, %arg1: memref<256x8xf32, #tpu.memory_space<vmem>>, %arg2: memref<8x64xf32, #tpu.memory_space<vmem>>, %arg3: memref<64x64xf32, #tpu.memory_space<vmem>>, %arg4: memref<64x32xf32, #tpu.memory_space<vmem>>, %arg5: memref<5x64xf32, #tpu.memory_space<vmem>>, %arg6: memref<256x32xf32, #tpu.memory_space<vmem>>) attributes {dimension_semantics = [#tpu.dimension_semantics<parallel>], iteration_bounds = array<i64: 1>, scalar_prefetch = 0 : i64, scratch_operands = 0 : i64, tpu.core_type = #tpu.core_type<tc>, window_params = [{transform_indices = @transform_0, window_bounds = array<i64: 256, 8>}, {pipeline_mode = #tpu.pipeline_mode<synchronous>, transform_indices = @transform_1, window_bounds = array<i64: 8, 64>}, {pipeline_mode = #tpu.pipeline_mode<synchronous>, transform_indices = @transform_2, window_bounds = array<i64: 64, 64>}, {pipeline_mode = #tpu.pipeline_mode<synchronous>, transform_indices = @transform_3, window_bounds = array<i64: 64, 32>}, {pipeline_mode = #tpu.pipeline_mode<synchronous>, transform_indices = @transform_4, window_bounds = array<i64: 5, 64>}, {transform_indices = @transform_5, window_bounds = array<i64: 256, 32>}]} {
    %c0 = arith.constant 0 : index
    %c0_0 = arith.constant 0 : index
    %0 = vector.load %arg5[%c0, %c0_0] : memref<5x64xf32, #tpu.memory_space<vmem>>, vector<5x64xf32>
    %c0_1 = arith.constant 0 : index
    %c0_2 = arith.constant 0 : index
    %1 = vector.load %arg1[%c0_1, %c0_2] : memref<256x8xf32, #tpu.memory_space<vmem>>, vector<256x8xf32>
    %c0_3 = arith.constant 0 : index
    %c0_4 = arith.constant 0 : index
    %2 = vector.load %arg2[%c0_3, %c0_4] : memref<8x64xf32, #tpu.memory_space<vmem>>, vector<8x64xf32>
    %3 = vector.extract_strided_slice %0 {offsets = [0, 0], sizes = [1, 64], strides = [1, 1]} : vector<5x64xf32> to vector<1x64xf32>
    %cst = arith.constant dense<0.000000e+00> : vector<256x64xf32>
    %4 = tpu.matmul %1, %2, %cst {dimension_numbers = #tpu.dot_dimension_numbers<[1], [0], [0], [1], [0, 0, 1, 1], [], []>} : vector<256x8xf32>, vector<8x64xf32>, vector<256x64xf32> -> vector<256x64xf32>
    %5 = vector.broadcast %3 : vector<1x64xf32> to vector<256x64xf32>
    %6 = arith.addf %4, %5 : vector<256x64xf32>
    %cst_5 = arith.constant 0.000000e+00 : f32
    %7 = vector.broadcast %cst_5 : f32 to vector<256x64xf32>
    %8 = arith.maximumf %6, %7 : vector<256x64xf32>
    %c0_6 = arith.constant 0 : index
    %c0_7 = arith.constant 0 : index
    %9 = vector.load %arg3[%c0_6, %c0_7] : memref<64x64xf32, #tpu.memory_space<vmem>>, vector<64x64xf32>
    %10 = vector.extract_strided_slice %0 {offsets = [1, 0], sizes = [1, 64], strides = [1, 1]} : vector<5x64xf32> to vector<1x64xf32>
    %cst_8 = arith.constant dense<0.000000e+00> : vector<256x64xf32>
    %11 = tpu.matmul %8, %9, %cst_8 {dimension_numbers = #tpu.dot_dimension_numbers<[1], [0], [0], [1], [0, 0, 1, 1], [], []>} : vector<256x64xf32>, vector<64x64xf32>, vector<256x64xf32> -> vector<256x64xf32>
    %12 = vector.broadcast %10 : vector<1x64xf32> to vector<256x64xf32>
    %13 = arith.addf %11, %12 : vector<256x64xf32>
    %cst_9 = arith.constant 0.000000e+00 : f32
    %14 = vector.broadcast %cst_9 : f32 to vector<256x64xf32>
    %15 = arith.maximumf %13, %14 : vector<256x64xf32>
    %c0_10 = arith.constant 0 : index
    %c0_11 = arith.constant 0 : index
    %16 = vector.load %arg4[%c0_10, %c0_11] : memref<64x32xf32, #tpu.memory_space<vmem>>, vector<64x32xf32>
    %17 = vector.extract_strided_slice %0 {offsets = [2, 0], sizes = [1, 32], strides = [1, 1]} : vector<5x64xf32> to vector<1x32xf32>
    %cst_12 = arith.constant dense<0.000000e+00> : vector<256x32xf32>
    %18 = tpu.matmul %15, %16, %cst_12 {dimension_numbers = #tpu.dot_dimension_numbers<[1], [0], [0], [1], [0, 0, 1, 1], [], []>} : vector<256x64xf32>, vector<64x32xf32>, vector<256x32xf32> -> vector<256x32xf32>
    %19 = vector.broadcast %17 : vector<1x32xf32> to vector<256x32xf32>
    %20 = arith.addf %18, %19 : vector<256x32xf32>
    %21 = vector.extract_strided_slice %0 {offsets = [3, 0], sizes = [1, 32], strides = [1, 1]} : vector<5x64xf32> to vector<1x32xf32>
    %22 = vector.extract_strided_slice %0 {offsets = [4, 0], sizes = [1, 32], strides = [1, 1]} : vector<5x64xf32> to vector<1x32xf32>
    %cst_13 = arith.constant dense<0.000000e+00> : vector<256xf32>
    %23 = vector.multi_reduction <add>, %20, %cst_13 [1] : vector<256x32xf32> to vector<256xf32>
    %24 = vector.shape_cast %23 : vector<256xf32> to vector<256x1xf32>
    %cst_14 = arith.constant 3.200000e+01 : f32
    %25 = vector.broadcast %cst_14 : f32 to vector<256x1xf32>
    %26 = arith.divf %24, %25 : vector<256x1xf32>
    %27 = vector.broadcast %26 : vector<256x1xf32> to vector<256x32xf32>
    %28 = arith.subf %20, %27 : vector<256x32xf32>
    %29 = arith.mulf %28, %28 : vector<256x32xf32>
    %cst_15 = arith.constant dense<0.000000e+00> : vector<256xf32>
    %30 = vector.multi_reduction <add>, %29, %cst_15 [1] : vector<256x32xf32> to vector<256xf32>
    %31 = vector.shape_cast %30 : vector<256xf32> to vector<256x1xf32>
    %cst_16 = arith.constant 3.200000e+01 : f32
    %32 = vector.broadcast %cst_16 : f32 to vector<256x1xf32>
    %33 = arith.divf %31, %32 : vector<256x1xf32>
    %cst_17 = arith.constant 9.99999974E-6 : f32
    %34 = vector.broadcast %cst_17 : f32 to vector<256x1xf32>
    %35 = arith.addf %33, %34 : vector<256x1xf32>
    %36 = math.rsqrt %35 : vector<256x1xf32>
    %37 = vector.broadcast %36 : vector<256x1xf32> to vector<256x32xf32>
    %38 = arith.mulf %28, %37 : vector<256x32xf32>
    %39 = vector.broadcast %21 : vector<1x32xf32> to vector<256x32xf32>
    %40 = arith.mulf %38, %39 : vector<256x32xf32>
    %41 = vector.broadcast %22 : vector<1x32xf32> to vector<256x32xf32>
    %42 = arith.addf %40, %41 : vector<256x32xf32>
    %c0_18 = arith.constant 0 : index
    %c0_19 = arith.constant 0 : index
    %43 = vector.load %arg6[%c0_18, %c0_19] : memref<256x32xf32, #tpu.memory_space<vmem>>, vector<256x32xf32>
    tpu.vector_store %arg6[%c0_18, %c0_19], %42 {strides = array<i32>} : memref<256x32xf32, #tpu.memory_space<vmem>>, vector<256x32xf32>,
    return
  }
  func.func @transform_0(%arg0: i32) -> (i32, i32) {
    %c0_i32 = arith.constant 0 : i32
    %c0_i32_0 = arith.constant 0 : i32
    return %arg0, %c0_i32 : i32, i32
  }
  func.func @transform_1(%arg0: i32) -> (i32, i32) {
    %c0_i32 = arith.constant 0 : i32
    %c0_i32_0 = arith.constant 0 : i32
    %c0_i32_1 = arith.constant 0 : i32
    return %c0_i32, %c0_i32_0 : i32, i32
  }
  func.func @transform_2(%arg0: i32) -> (i32, i32) {
    %c0_i32 = arith.constant 0 : i32
    %c0_i32_0 = arith.constant 0 : i32
    %c0_i32_1 = arith.constant 0 : i32
    return %c0_i32, %c0_i32_0 : i32, i32
  }
  func.func @transform_3(%arg0: i32) -> (i32, i32) {
    %c0_i32 = arith.constant 0 : i32
    %c0_i32_0 = arith.constant 0 : i32
    %c0_i32_1 = arith.constant 0 : i32
    return %c0_i32, %c0_i32_0 : i32, i32
  }
  func.func @transform_4(%arg0: i32) -> (i32, i32) {
    %c0_i32 = arith.constant 0 : i32
    %c0_i32_0 = arith.constant 0 : i32
    %c0_i32_1 = arith.constant 0 : i32
    return %c0_i32, %c0_i32_0 : i32, i32
  }
  func.func @transform_5(%arg0: i32) -> (i32, i32) {
    %c0_i32 = arith.constant 0 : i32
    %c0_i32_0 = arith.constant 0 : i32
    return %arg0, %c0_i32 : i32, i32
  }
}

module attributes {stable_mosaic.version = 11 : i64} {
  func.func @_mlp_ln_kernel(%arg0: i32, %arg1: memref<128x16xf32, #tpu.memory_space<vmem>>, %arg2: memref<16x64xf32, #tpu.memory_space<vmem>>, %arg3: memref<64x64xf32, #tpu.memory_space<vmem>>, %arg4: memref<64x32xf32, #tpu.memory_space<vmem>>, %arg5: memref<5x64xf32, #tpu.memory_space<vmem>>, %arg6: memref<128x32xf32, #tpu.memory_space<vmem>>) attributes {dimension_semantics = [#tpu.dimension_semantics<parallel>], iteration_bounds = array<i64: 1>, scalar_prefetch = 0 : i64, scratch_operands = 0 : i64, tpu.core_type = #tpu.core_type<tc>, window_params = [{transform_indices = @transform_0, window_bounds = array<i64: 128, 16>}, {pipeline_mode = #tpu.pipeline_mode<synchronous>, transform_indices = @transform_1, window_bounds = array<i64: 16, 64>}, {pipeline_mode = #tpu.pipeline_mode<synchronous>, transform_indices = @transform_2, window_bounds = array<i64: 64, 64>}, {pipeline_mode = #tpu.pipeline_mode<synchronous>, transform_indices = @transform_3, window_bounds = array<i64: 64, 32>}, {pipeline_mode = #tpu.pipeline_mode<synchronous>, transform_indices = @transform_4, window_bounds = array<i64: 5, 64>}, {transform_indices = @transform_5, window_bounds = array<i64: 128, 32>}]} {
    %c0 = arith.constant 0 : index
    %c0_0 = arith.constant 0 : index
    %0 = vector.load %arg5[%c0, %c0_0] : memref<5x64xf32, #tpu.memory_space<vmem>>, vector<5x64xf32>
    %c0_1 = arith.constant 0 : index
    %c0_2 = arith.constant 0 : index
    %1 = vector.load %arg1[%c0_1, %c0_2] : memref<128x16xf32, #tpu.memory_space<vmem>>, vector<128x16xf32>
    %c0_3 = arith.constant 0 : index
    %c0_4 = arith.constant 0 : index
    %2 = vector.load %arg2[%c0_3, %c0_4] : memref<16x64xf32, #tpu.memory_space<vmem>>, vector<16x64xf32>
    %3 = vector.extract_strided_slice %0 {offsets = [0, 0], sizes = [1, 64], strides = [1, 1]} : vector<5x64xf32> to vector<1x64xf32>
    %cst = arith.constant dense<0.000000e+00> : vector<128x64xf32>
    %4 = tpu.matmul %1, %2, %cst {dimension_numbers = #tpu.dot_dimension_numbers<[1], [0], [0], [1], [0, 0, 1, 1], [], []>} : vector<128x16xf32>, vector<16x64xf32>, vector<128x64xf32> -> vector<128x64xf32>
    %5 = vector.broadcast %3 : vector<1x64xf32> to vector<128x64xf32>
    %6 = arith.addf %4, %5 : vector<128x64xf32>
    %cst_5 = arith.constant 0.000000e+00 : f32
    %7 = vector.broadcast %cst_5 : f32 to vector<128x64xf32>
    %8 = arith.maximumf %6, %7 : vector<128x64xf32>
    %c0_6 = arith.constant 0 : index
    %c0_7 = arith.constant 0 : index
    %9 = vector.load %arg3[%c0_6, %c0_7] : memref<64x64xf32, #tpu.memory_space<vmem>>, vector<64x64xf32>
    %10 = vector.extract_strided_slice %0 {offsets = [1, 0], sizes = [1, 64], strides = [1, 1]} : vector<5x64xf32> to vector<1x64xf32>
    %cst_8 = arith.constant dense<0.000000e+00> : vector<128x64xf32>
    %11 = tpu.matmul %8, %9, %cst_8 {dimension_numbers = #tpu.dot_dimension_numbers<[1], [0], [0], [1], [0, 0, 1, 1], [], []>} : vector<128x64xf32>, vector<64x64xf32>, vector<128x64xf32> -> vector<128x64xf32>
    %12 = vector.broadcast %10 : vector<1x64xf32> to vector<128x64xf32>
    %13 = arith.addf %11, %12 : vector<128x64xf32>
    %cst_9 = arith.constant 0.000000e+00 : f32
    %14 = vector.broadcast %cst_9 : f32 to vector<128x64xf32>
    %15 = arith.maximumf %13, %14 : vector<128x64xf32>
    %c0_10 = arith.constant 0 : index
    %c0_11 = arith.constant 0 : index
    %16 = vector.load %arg4[%c0_10, %c0_11] : memref<64x32xf32, #tpu.memory_space<vmem>>, vector<64x32xf32>
    %17 = vector.extract_strided_slice %0 {offsets = [2, 0], sizes = [1, 32], strides = [1, 1]} : vector<5x64xf32> to vector<1x32xf32>
    %cst_12 = arith.constant dense<0.000000e+00> : vector<128x32xf32>
    %18 = tpu.matmul %15, %16, %cst_12 {dimension_numbers = #tpu.dot_dimension_numbers<[1], [0], [0], [1], [0, 0, 1, 1], [], []>} : vector<128x64xf32>, vector<64x32xf32>, vector<128x32xf32> -> vector<128x32xf32>
    %19 = vector.broadcast %17 : vector<1x32xf32> to vector<128x32xf32>
    %20 = arith.addf %18, %19 : vector<128x32xf32>
    %21 = vector.extract_strided_slice %0 {offsets = [3, 0], sizes = [1, 32], strides = [1, 1]} : vector<5x64xf32> to vector<1x32xf32>
    %22 = vector.extract_strided_slice %0 {offsets = [4, 0], sizes = [1, 32], strides = [1, 1]} : vector<5x64xf32> to vector<1x32xf32>
    %cst_13 = arith.constant dense<0.000000e+00> : vector<128xf32>
    %23 = vector.multi_reduction <add>, %20, %cst_13 [1] : vector<128x32xf32> to vector<128xf32>
    %24 = vector.shape_cast %23 : vector<128xf32> to vector<128x1xf32>
    %cst_14 = arith.constant 3.200000e+01 : f32
    %25 = vector.broadcast %cst_14 : f32 to vector<128x1xf32>
    %26 = arith.divf %24, %25 : vector<128x1xf32>
    %27 = vector.broadcast %26 : vector<128x1xf32> to vector<128x32xf32>
    %28 = arith.subf %20, %27 : vector<128x32xf32>
    %29 = arith.mulf %28, %28 : vector<128x32xf32>
    %cst_15 = arith.constant dense<0.000000e+00> : vector<128xf32>
    %30 = vector.multi_reduction <add>, %29, %cst_15 [1] : vector<128x32xf32> to vector<128xf32>
    %31 = vector.shape_cast %30 : vector<128xf32> to vector<128x1xf32>
    %cst_16 = arith.constant 3.200000e+01 : f32
    %32 = vector.broadcast %cst_16 : f32 to vector<128x1xf32>
    %33 = arith.divf %31, %32 : vector<128x1xf32>
    %cst_17 = arith.constant 9.99999974E-6 : f32
    %34 = vector.broadcast %cst_17 : f32 to vector<128x1xf32>
    %35 = arith.addf %33, %34 : vector<128x1xf32>
    %36 = math.rsqrt %35 : vector<128x1xf32>
    %37 = vector.broadcast %36 : vector<128x1xf32> to vector<128x32xf32>
    %38 = arith.mulf %28, %37 : vector<128x32xf32>
    %39 = vector.broadcast %21 : vector<1x32xf32> to vector<128x32xf32>
    %40 = arith.mulf %38, %39 : vector<128x32xf32>
    %41 = vector.broadcast %22 : vector<1x32xf32> to vector<128x32xf32>
    %42 = arith.addf %40, %41 : vector<128x32xf32>
    %c0_18 = arith.constant 0 : index
    %c0_19 = arith.constant 0 : index
    %43 = vector.load %arg6[%c0_18, %c0_19] : memref<128x32xf32, #tpu.memory_space<vmem>>, vector<128x32xf32>
    tpu.vector_store %arg6[%c0_18, %c0_19], %42 {strides = array<i32>} : memref<128x32xf32, #tpu.memory_space<vmem>>, vector<128x32xf32>,
    return
  }
  func.func @transform_0(%arg0: i32) -> (i32, i32) {
    %c0_i32 = arith.constant 0 : i32
    %c0_i32_0 = arith.constant 0 : i32
    return %arg0, %c0_i32 : i32, i32
  }
  func.func @transform_1(%arg0: i32) -> (i32, i32) {
    %c0_i32 = arith.constant 0 : i32
    %c0_i32_0 = arith.constant 0 : i32
    %c0_i32_1 = arith.constant 0 : i32
    return %c0_i32, %c0_i32_0 : i32, i32
  }
  func.func @transform_2(%arg0: i32) -> (i32, i32) {
    %c0_i32 = arith.constant 0 : i32
    %c0_i32_0 = arith.constant 0 : i32
    %c0_i32_1 = arith.constant 0 : i32
    return %c0_i32, %c0_i32_0 : i32, i32
  }
  func.func @transform_3(%arg0: i32) -> (i32, i32) {
    %c0_i32 = arith.constant 0 : i32
    %c0_i32_0 = arith.constant 0 : i32
    %c0_i32_1 = arith.constant 0 : i32
    return %c0_i32, %c0_i32_0 : i32, i32
  }
  func.func @transform_4(%arg0: i32) -> (i32, i32) {
    %c0_i32 = arith.constant 0 : i32
    %c0_i32_0 = arith.constant 0 : i32
    %c0_i32_1 = arith.constant 0 : i32
    return %c0_i32, %c0_i32_0 : i32, i32
  }
  func.func @transform_5(%arg0: i32) -> (i32, i32) {
    %c0_i32 = arith.constant 0 : i32
    %c0_i32_0 = arith.constant 0 : i32
    return %arg0, %c0_i32 : i32, i32
  }
}

</mosaic_0001>

<bundles_post_ra>
// kernel: _lambda_.2
= control target key start
LH: loop header
LB: loop body
LE: loop exit
PB: predicated region body
PF: predicated region fallthrough
CT: control target
= control target key end

     0   :  { %vm43_vm0 = vcmask 130048   ;;  %v39_v40 = vlaneseq  ;;  %vm265_vm1 = vcmask 523264   ;;  %vm680_vm2 = vcmask 261120   ;;  %s1715_s1 = inlined_call_operand.vmem [shape: f32[16,64], index: 1, kind: input, shape index: {}]   ;;  %s1716_s0 = inlined_call_operand.vmem [shape: f32[128,16], index: 0, kind: input, shape index: {}]   ;;  %s1717_s2 = inlined_call_operand.vmem [shape: f32[64,64], index: 2, kind: input, shape index: {}]   ;;  %s1718_s3 = inlined_call_operand.vmem [shape: f32[64,32], index: 3, kind: input, shape index: {}]   ;;  %s1719_s4 = inlined_call_operand.vmem [shape: f32[5,64], index: 4, kind: input, shape index: {}]   ;;  %s1720_s5 = inlined_call_operand.vmem [shape: f32[128,32], index: 5, kind: output, shape index: {}]  }
   0x1   :  { %v37_v0 = vld [vmem:[%s1715_s1] sm:$0xff]  ;;  %v38_v1 = vld [vmem:[%s1715_s1 + $0x8] sm:$0xff]  ;;  %v23_v7 = vld [vmem:[%s1716_s0 + $0x10] sm:$0xff] }
   0x2   :  { %v21_v2 = vld [vmem:[%s1716_s0] sm:$0xff]  ;;  %v1172_v3 = vpack.c.bf16 %v38_v1, %v37_v0  ;;  %v22_v5 = vld [vmem:[%s1716_s0 + $0x8] sm:$0xff]  ;;  %v31_v8 = vld [vmem:[%s1716_s0 + $0x50] sm:$0xff]  ;;  %v1384_v41 = vshrl.u32 %v39_v40, 7 }
   0x3   :  { %1068 = vmatprep.mubr.msk.f32.mxu0 %vm43_vm0, %v21_v2  ;;  %v29_v4 = vld [vmem:[%s1716_s0 + $0x40] sm:$0xff]  ;;  %v30_v6 = vld [vmem:[%s1716_s0 + $0x48] sm:$0xff]  ;;  %v255_v11 = vld [vmem:[%s1717_s2 + $0x10] sm:$0xff] }
   0x4   :  { %1173 = vmatprep.subr.bf16.mxu0 %v1172_v3  ;;  %1208 = vmatprep.subr.bf16.mxu1 %v1172_v3  ;;  %v253_v9 = vld [vmem:[%s1717_s2] sm:$0xff]  ;;  %v254_v10 = vld [vmem:[%s1717_s2 + $0x8] sm:$0xff]  ;;  %v256_v13 = vld [vmem:[%s1717_s2 + $0x18] sm:$0xff]  ;;  %v41_v42 = vsub.s32 0, %v1384_v41 }
   0x5   :  { %1175 = vmatpush3.bf16.msra.mxu0 %v1172_v3  ;;  %1209 = vmatpush3.bf16.msra.mxu1 %v1172_v3  ;;  %v1176_v12 = vpack.c.bf16 %v254_v10, %v253_v9  ;;  %v24_v14 = vld [vmem:[%s1716_s0 + $0x18] sm:$0xff]  ;;  %v25_v16 = vld [vmem:[%s1716_s0 + $0x20] sm:$0xff]  ;;  %v1180_v18 = vpack.c.bf16 %v256_v13, %v255_v11  ;;  %v258_v20 = vld [vmem:[%s1717_s2 + $0x28] sm:$0xff] }
   0x6   :  { %1080 = vmatprep.mubr.msk.f32.mxu1 %vm43_vm0, %v29_v4  ;;  %v32_v15 = vld [vmem:[%s1716_s0 + $0x58] sm:$0xff]  ;;  %v33_v17 = vld [vmem:[%s1716_s0 + $0x60] sm:$0xff]  ;;  %v26_v21 = vld [vmem:[%s1716_s0 + $0x28] sm:$0xff] }
   0x7   :  { %1177 = vmatprep.subr.bf16.mxu1 %v1176_v12  ;;  %v257_v19 = vld [vmem:[%s1717_s2 + $0x20] sm:$0xff]  ;;  %v34_v22 = vld [vmem:[%s1716_s0 + $0x68] sm:$0xff]  ;;  %v27_v23 = vld [vmem:[%s1716_s0 + $0x30] sm:$0xff] }
   0x8   :  { %1069 = vmatmul.mubr.msk.f32.vlgmr.msra.gmra.mrb[0].mxu0 %vm43_vm0, %v22_v5  ;;  %1081 = vmatmul.mubr.msk.f32.vlgmr.msra.gmra.mrb[0].mxu1 %vm43_vm0, %v30_v6  ;;  %v35_v24 = vld [vmem:[%s1716_s0 + $0x70] sm:$0xff]  ;;  %v1184_v25 = vpack.c.bf16 %v258_v20, %v257_v19  ;;  %v28_v26 = vld [vmem:[%s1716_s0 + $0x38] sm:$0xff]  ;;  %v475_v31 = vld [vmem:[%s1718_s3] sm:$0xff] }
   0x9   :  { %1071 = vmatprep.mubr.msk.f32.mxu0 %vm43_vm0, %v23_v7  ;;  %1083 = vmatprep.mubr.msk.f32.mxu1 %vm43_vm0, %v31_v8  ;;  %v36_v27 = vld [vmem:[%s1716_s0 + $0x78] sm:$0xff]  ;;  %v259_v28 = vld [vmem:[%s1717_s2 + $0x30] sm:$0xff]  ;;  %v476_v32 = vld [vmem:[%s1718_s3 + $0x8] sm:$0xff] }
   0xa   :  { %1179 = vmatpush3.bf16.msra.mxu1 %v1176_v12  ;;  %v260_v29 = vld [vmem:[%s1717_s2 + $0x38] sm:$0xff]  ;;  %v477_v33 = vld [vmem:[%s1718_s3 + $0x10] sm:$0xff]  ;;  %v1192_v34 = vpack.c.bf16 %v476_v32, %v475_v31  ;;  %v479_v37 = vld [vmem:[%s1718_s3 + $0x20] sm:$0xff]  ;;  %v263_v32 = vsub.s32 1, %v1384_v41 }
   0xb   :  { %1181 = vmatprep.subr.bf16.mxu1 %v1180_v18  ;;  %v1188_v30 = vpack.c.bf16 %v260_v29, %v259_v28  ;;  %v478_v35 = vld [vmem:[%s1718_s3 + $0x18] sm:$0xff]  ;;  %v480_v38 = vld [vmem:[%s1718_s3 + $0x28] sm:$0xff]  ;;  %v1390_v43 = vld [vmem:[%s1719_s4] sm:$0x1f] }
   0xc   :  { %1072 = vmatmul.mubr.msk.f32.gmra.mrb[2].mxu0 %vm43_vm0, %v24_v14  ;;  %1084 = vmatmul.mubr.msk.f32.gmra.mrb[2].mxu1 %vm43_vm0, %v32_v15  ;;  %v1196_v36 = vpack.c.bf16 %v478_v35, %v477_v33  ;;  %v1200_v39 = vpack.c.bf16 %v480_v38, %v479_v37  ;;  %v42_v44 = vrot.slane %v1390_v43, %v41_v42  ;;  %v481_v29 = vld [vmem:[%s1718_s3 + $0x30] sm:$0xff] }
   0xd   :  { %1074 = vmatprep.mubr.msk.f32.mxu0 %vm43_vm0, %v25_v16  ;;  %1086 = vmatprep.mubr.msk.f32.mxu1 %vm43_vm0, %v33_v17  ;;  %v264_v33 = vrot.slane %v1390_v43, %v263_v32 }
   0xe   :  { %1183 = vmatpush3.bf16.msra.mxu1 %v1180_v18  ;;  %1193 = vmatprep.subr.bf16.mxu0 %v1192_v34 }
   0xf   :  { %1185 = vmatprep.subr.bf16.mxu1 %v1184_v25  ;;  %1195 = vmatpush3.bf16.msra.mxu0 %v1192_v34 }
  0x10   :  { %1075 = vmatmul.mubr.msk.f32.gmra.mrb[4].mxu0 %vm43_vm0, %v26_v21  ;;  %1087 = vmatmul.mubr.msk.f32.gmra.mrb[4].mxu1 %vm43_vm0, %v34_v22 }
  0x11   :  { %1077 = vmatprep.mubr.msk.f32.mxu0 %vm43_vm0, %v27_v23  ;;  %1089 = vmatprep.mubr.msk.f32.mxu1 %vm43_vm0, %v35_v24 }
  0x12   :  { %1187 = vmatpush3.bf16.msra.mxu1 %v1184_v25  ;;  %1197 = vmatprep.subr.bf16.mxu0 %v1196_v36 }
  0x13   :  { %1189 = vmatprep.subr.bf16.mxu1 %v1188_v30  ;;  %1199 = vmatpush3.bf16.msra.mxu0 %v1196_v36 }
  0x14   :  { %1078 = vmatmul.mubr.msk.f32.gmra.mrb[6].mxu0 %vm43_vm0, %v28_v26  ;;  %1090 = vmatmul.mubr.msk.f32.gmra.mrb[6].mxu1 %vm43_vm0, %v36_v27 }
  0x15   :  { %1201 = vmatprep.subr.bf16.mxu0 %v1200_v39 }
  0x16   :  { %1191 = vmatpush3.bf16.msra.mxu1 %v1188_v30  ;;  %v482_v30 = vld [vmem:[%s1718_s3 + $0x38] sm:$0xff] }
  0x17   :  { %1203 = vmatpush3.bf16.msra.mxu0 %v1200_v39  ;;  %v1204_v31 = vpack.c.bf16 %v482_v30, %v481_v29 }
  0x19   :  { %1205 = vmatprep.subr.bf16.mxu0 %v1204_v31 }
  0x1b   :  { %1207 = vmatpush3.bf16.msra.mxu0 %v1204_v31 }
  0xdb   :  { %v1070_v45 = vpop.f32.mrb[0].mxu0  ;;  %v1082_v46 = vpop.f32.mrb[0].mxu1 }
  0xdc   :  { %v164_v47 = vadd.f32 %v1070_v45, %v42_v44  ;;  %v158_v48 = vpop.f32.mrb[1].mxu0  ;;  %v198_v49 = vpop.f32.mrb[1].mxu1  ;;  %v204_v13 = vadd.f32 %v1082_v46, %v42_v44 }
  0xdd   :  { %v159_v50 = vadd.f32 %v158_v48, %v42_v44  ;;  %v199_v6 = vadd.f32 %v198_v49, %v42_v44 }
  0xde   :  { %v238_v54 = vmax.f32 %v164_v47, 0.0  ;;  %v246_v17 = vmax.f32 %v204_v13, 0.0 }
  0xdf   :  { %v237_v51 = vmax.f32 %v159_v50, 0.0  ;;  %v1073_v52 = vpop.f32.mrb[2].mxu0  ;;  %v1085_v53 = vpop.f32.mrb[2].mxu1  ;;  %v245_v15 = vmax.f32 %v199_v6, 0.0 }
  0xe0   :  { %v174_v55 = vadd.f32 %v1073_v52, %v42_v44  ;;  %v168_v56 = vpop.f32.mrb[3].mxu0  ;;  %v208_v57 = vpop.f32.mrb[3].mxu1  ;;  %v214_v18 = vadd.f32 %v1085_v53, %v42_v44 }
  0xe1   :  { %v169_v58 = vadd.f32 %v168_v56, %v42_v44  ;;  %1108 = vmatprep.mubr.msk.f32.mxu1 %vm265_vm1, %v237_v51  ;;  %v209_v16 = vadd.f32 %v208_v57, %v42_v44 }
  0xe2   :  { %1109 = vmatmul.mubr.msk.f32.vlgmr.msra.gmra.mrb[8].mxu1 %vm265_vm1, %v238_v54  ;;  %v240_v62 = vmax.f32 %v174_v55, 0.0  ;;  %v248_v21 = vmax.f32 %v214_v18, 0.0 }
  0xe3   :  { %v239_v59 = vmax.f32 %v169_v58, 0.0  ;;  %v1076_v60 = vpop.f32.mrb[4].mxu0  ;;  %v1088_v61 = vpop.f32.mrb[4].mxu1  ;;  %v247_v19 = vmax.f32 %v209_v16, 0.0 }
  0xe4   :  { %v184_v63 = vadd.f32 %v1076_v60, %v42_v44  ;;  %v178_v0 = vpop.f32.mrb[5].mxu0  ;;  %v218_v1 = vpop.f32.mrb[5].mxu1  ;;  %v224_v22 = vadd.f32 %v1088_v61, %v42_v44 }
  0xe5   :  { %v179_v2 = vadd.f32 %v178_v0, %v42_v44  ;;  %1111 = vmatprep.mubr.msk.f32.mxu1 %vm265_vm1, %v239_v59  ;;  %v219_v20 = vadd.f32 %v218_v1, %v42_v44 }
  0xe6   :  { %v242_v3 = vmax.f32 %v184_v63, 0.0  ;;  %1112 = vmatmul.mubr.msk.f32.gmra.mrb[10].mxu1 %vm265_vm1, %v240_v62  ;;  %v250_v25 = vmax.f32 %v224_v22, 0.0 }
  0xe7   :  { %v241_v4 = vmax.f32 %v179_v2, 0.0  ;;  %v1079_v5 = vpop.f32.mrb[6].mxu0  ;;  %v1091_v7 = vpop.f32.mrb[6].mxu1  ;;  %v249_v23 = vmax.f32 %v219_v20, 0.0  ;;  %v485_v20 = vsub.s32 2, %v1384_v41 }
  0xe8   :  { %v194_v8 = vadd.f32 %v1079_v5, %v42_v44  ;;  %v188_v9 = vpop.f32.mrb[7].mxu0  ;;  %v228_v10 = vpop.f32.mrb[7].mxu1  ;;  %v234_v26 = vadd.f32 %v1091_v7, %v42_v44 }
  0xe9   :  { %v189_v11 = vadd.f32 %v188_v9, %v42_v44  ;;  %1114 = vmatprep.mubr.msk.f32.mxu1 %vm265_vm1, %v241_v4  ;;  %v229_v24 = vadd.f32 %v228_v10, %v42_v44 }
  0xea   :  { %v244_v12 = vmax.f32 %v194_v8, 0.0  ;;  %1115 = vmatmul.mubr.msk.f32.gmra.mrb[12].mxu1 %vm265_vm1, %v242_v3  ;;  %v252_v28 = vmax.f32 %v234_v26, 0.0 }
  0xeb   :  { %v243_v14 = vmax.f32 %v189_v11, 0.0  ;;  %v251_v27 = vmax.f32 %v229_v24, 0.0 }
  0xed   :  { %1117 = vmatprep.mubr.msk.f32.mxu1 %vm265_vm1, %v243_v14 }
  0xee   :  { %1118 = vmatmul.mubr.msk.f32.gmra.mrb[14].mxu1 %vm265_vm1, %v244_v12 }
  0xef   :  { %1120 = vmatprep.mubr.msk.f32.mxu1 %vm265_vm1, %v245_v15 }
  0xf2   :  { %1121 = vmatmul.mubr.msk.f32.gmra.mrb[16].mxu1 %vm265_vm1, %v246_v17 }
  0xf3   :  { %1123 = vmatprep.mubr.msk.f32.mxu1 %vm265_vm1, %v247_v19 }
  0xf6   :  { %1124 = vmatmul.mubr.msk.f32.gmra.mrb[18].mxu1 %vm265_vm1, %v248_v21  ;;  %v486_v21 = vrot.slane %v1390_v43, %v485_v20 }
  0xf7   :  { %1126 = vmatprep.mubr.msk.f32.mxu1 %vm265_vm1, %v249_v23 }
  0xfa   :  { %1127 = vmatmul.mubr.msk.f32.gmra.mrb[20].mxu1 %vm265_vm1, %v250_v25 }
  0xfb   :  { %1129 = vmatprep.mubr.msk.f32.mxu1 %vm265_vm1, %v251_v27 }
  0xfe   :  { %1130 = vmatmul.mubr.msk.f32.gmra.mrb[22].mxu1 %vm265_vm1, %v252_v28 }
 0x1b5   :  { %v1110_v34 = vpop.f32.mrb[8].mxu1 }
 0x1b6   :  { %v386_v35 = vadd.f32 %v1110_v34, %v264_v33  ;;  %v380_v36 = vpop.f32.mrb[9].mxu1 }
 0x1b7   :  { %v381_v37 = vadd.f32 %v380_v36, %v264_v33 }
 0x1b8   :  { %v460_v40 = vmax.f32 %v386_v35, 0.0 }
 0x1b9   :  { %v459_v38 = vmax.f32 %v381_v37, 0.0  ;;  %v1113_v39 = vpop.f32.mrb[10].mxu1 }
 0x1ba   :  { %v396_v42 = vadd.f32 %v1113_v39, %v264_v33  ;;  %v390_v44 = vpop.f32.mrb[11].mxu1 }
 0x1bb   :  { %v391_v45 = vadd.f32 %v390_v44, %v264_v33  ;;  %1148 = vmatprep.mubr.msk.f32.mxu0 %vm265_vm1, %v459_v38 }
 0x1bc   :  { %1149 = vmatmul.mubr.msk.f32.vlgmr.msra.gmra.mrb[8].mxu0 %vm265_vm1, %v460_v40  ;;  %v462_v48 = vmax.f32 %v396_v42, 0.0 }
 0x1bd   :  { %v461_v46 = vmax.f32 %v391_v45, 0.0  ;;  %v1116_v47 = vpop.f32.mrb[12].mxu1 }
 0x1be   :  { %v406_v49 = vadd.f32 %v1116_v47, %v264_v33  ;;  %v400_v50 = vpop.f32.mrb[13].mxu1 }
 0x1bf   :  { %v401_v51 = vadd.f32 %v400_v50, %v264_v33  ;;  %1151 = vmatprep.mubr.msk.f32.mxu0 %vm265_vm1, %v461_v46 }
 0x1c0   :  { %v464_v52 = vmax.f32 %v406_v49, 0.0  ;;  %1152 = vmatmul.mubr.msk.f32.gmra.mrb[10].mxu0 %vm265_vm1, %v462_v48 }
 0x1c1   :  { %v463_v53 = vmax.f32 %v401_v51, 0.0  ;;  %v1119_v54 = vpop.f32.mrb[14].mxu1 }
 0x1c2   :  { %v416_v55 = vadd.f32 %v1119_v54, %v264_v33  ;;  %v410_v56 = vpop.f32.mrb[15].mxu1 }
 0x1c3   :  { %v411_v57 = vadd.f32 %v410_v56, %v264_v33  ;;  %1154 = vmatprep.mubr.msk.f32.mxu0 %vm265_vm1, %v463_v53 }
 0x1c4   :  { %v466_v58 = vmax.f32 %v416_v55, 0.0  ;;  %1155 = vmatmul.mubr.msk.f32.gmra.mrb[12].mxu0 %vm265_vm1, %v464_v52 }
 0x1c5   :  { %v465_v59 = vmax.f32 %v411_v57, 0.0  ;;  %v1122_v60 = vpop.f32.mrb[16].mxu1 }
 0x1c6   :  { %v426_v61 = vadd.f32 %v1122_v60, %v264_v33  ;;  %v420_v62 = vpop.f32.mrb[17].mxu1 }
 0x1c7   :  { %v421_v63 = vadd.f32 %v420_v62, %v264_v33  ;;  %1157 = vmatprep.mubr.msk.f32.mxu0 %vm265_vm1, %v465_v59 }
 0x1c8   :  { %v468_v0 = vmax.f32 %v426_v61, 0.0  ;;  %1158 = vmatmul.mubr.msk.f32.gmra.mrb[14].mxu0 %vm265_vm1, %v466_v58 }
 0x1c9   :  { %v467_v1 = vmax.f32 %v421_v63, 0.0  ;;  %v1125_v2 = vpop.f32.mrb[18].mxu1 }
 0x1ca   :  { %v436_v3 = vadd.f32 %v1125_v2, %v264_v33  ;;  %v430_v4 = vpop.f32.mrb[19].mxu1 }
 0x1cb   :  { %v431_v5 = vadd.f32 %v430_v4, %v264_v33  ;;  %1160 = vmatprep.mubr.msk.f32.mxu0 %vm265_vm1, %v467_v1 }
 0x1cc   :  { %v470_v6 = vmax.f32 %v436_v3, 0.0  ;;  %1161 = vmatmul.mubr.msk.f32.gmra.mrb[16].mxu0 %vm265_vm1, %v468_v0 }
 0x1cd   :  { %v469_v7 = vmax.f32 %v431_v5, 0.0  ;;  %v1128_v8 = vpop.f32.mrb[20].mxu1 }
 0x1ce   :  { %v446_v9 = vadd.f32 %v1128_v8, %v264_v33  ;;  %v440_v10 = vpop.f32.mrb[21].mxu1 }
 0x1cf   :  { %v441_v11 = vadd.f32 %v440_v10, %v264_v33  ;;  %1163 = vmatprep.mubr.msk.f32.mxu0 %vm265_vm1, %v469_v7 }
 0x1d0   :  { %v472_v12 = vmax.f32 %v446_v9, 0.0  ;;  %1164 = vmatmul.mubr.msk.f32.gmra.mrb[18].mxu0 %vm265_vm1, %v470_v6 }
 0x1d1   :  { %v471_v13 = vmax.f32 %v441_v11, 0.0  ;;  %v1131_v14 = vpop.f32.mrb[22].mxu1 }
 0x1d2   :  { %v456_v15 = vadd.f32 %v1131_v14, %v264_v33  ;;  %v450_v16 = vpop.f32.mrb[23].mxu1 }
 0x1d3   :  { %v451_v17 = vadd.f32 %v450_v16, %v264_v33  ;;  %1166 = vmatprep.mubr.msk.f32.mxu0 %vm265_vm1, %v471_v13 }
 0x1d4   :  { %v474_v18 = vmax.f32 %v456_v15, 0.0  ;;  %1167 = vmatmul.mubr.msk.f32.gmra.mrb[20].mxu0 %vm265_vm1, %v472_v12 }
 0x1d5   :  { %v473_v19 = vmax.f32 %v451_v17, 0.0 }
 0x1d7   :  { %1169 = vmatprep.mubr.msk.f32.mxu0 %vm265_vm1, %v473_v19 }
 0x1d8   :  { %1170 = vmatmul.mubr.msk.f32.gmra.mrb[22].mxu0 %vm265_vm1, %v474_v18 }
 0x28f   :  { %v1150_v22 = vpop.f32.mrb[8].mxu0 }
 0x290   :  { %v1435_v23 = vadd.f32 %v1150_v22, %v486_v21  ;;  %v601_v24 = vpop.f32.mrb[9].mxu0 }
 0x291   :  { %v1437_v25 = vadd.f32 %v601_v24, %v486_v21 }
 0x292   :  { %v684_v26 = vsel %vm680_vm2, %v1435_v23, 0.0 }
 0x293   :  { %685 = vadd.xlane.f32.xlu0 %v684_v26  ;;  %v1153_v27 = vpop.f32.mrb[10].mxu0  ;;  %v681_v32 = vsel %vm680_vm2, %v1437_v25, 0.0 }
 0x294   :  { %v1441_v28 = vadd.f32 %v1153_v27, %v486_v21  ;;  %v611_v29 = vpop.f32.mrb[11].mxu0 }
 0x295   :  { %v1443_v30 = vadd.f32 %v611_v29, %v486_v21 }
 0x296   :  { %v690_v31 = vsel %vm680_vm2, %v1441_v28, 0.0 }
 0x297   :  { %691 = vadd.xlane.f32.xlu1 %v690_v31  ;;  %v1156_v33 = vpop.f32.mrb[12].mxu0  ;;  %682 = vadd.xlane.f32.xlu0 %v681_v32  ;;  %v687_v37 = vsel %vm680_vm2, %v1443_v30, 0.0 }
 0x298   :  { %v621_v34 = vpop.f32.mrb[13].mxu0  ;;  %v1451_v36 = vadd.f32 %v1156_v33, %v486_v21 }
 0x299   :  { %v1449_v35 = vadd.f32 %v621_v34, %v486_v21 }
 0x29a   :  { %v696_v45 = vsel %vm680_vm2, %v1451_v36, 0.0 }
 0x29b   :  { %v1159_v38 = vpop.f32.mrb[14].mxu0  ;;  %688 = vadd.xlane.f32.xlu1 %v687_v37  ;;  %v693_v39 = vsel %vm680_vm2, %v1449_v35, 0.0 }
 0x29c   :  { %v631_v40 = vpop.f32.mrb[15].mxu0  ;;  %694 = vadd.xlane.f32.xlu0 %v693_v39  ;;  %v1459_v44 = vadd.f32 %v1159_v38, %v486_v21 }
 0x29d   :  { %v1457_v42 = vadd.f32 %v631_v40, %v486_v21 }
 0x29e   :  { %v702_v51 = vsel %vm680_vm2, %v1459_v44, 0.0 }
 0x29f   :  { %v1162_v46 = vpop.f32.mrb[16].mxu0  ;;  %697 = vadd.xlane.f32.xlu1 %v696_v45  ;;  %v699_v47 = vsel %vm680_vm2, %v1457_v42, 0.0 }
 0x2a0   :  { %v641_v48 = vpop.f32.mrb[17].mxu0  ;;  %700 = vadd.xlane.f32.xlu0 %v699_v47  ;;  %v1467_v50 = vadd.f32 %v1162_v46, %v486_v21 }
 0x2a1   :  { %v1465_v49 = vadd.f32 %v641_v48, %v486_v21 }
 0x2a2   :  { %v708_v57 = vsel %vm680_vm2, %v1467_v50, 0.0 }
 0x2a3   :  { %v1165_v52 = vpop.f32.mrb[18].mxu0  ;;  %703 = vadd.xlane.f32.xlu1 %v702_v51  ;;  %v705_v53 = vsel %vm680_vm2, %v1465_v49, 0.0 }
 0x2a4   :  { %v651_v54 = vpop.f32.mrb[19].mxu0  ;;  %706 = vadd.xlane.f32.xlu0 %v705_v53  ;;  %v1475_v56 = vadd.f32 %v1165_v52, %v486_v21 }
 0x2a5   :  { %v1473_v55 = vadd.f32 %v651_v54, %v486_v21 }
 0x2a6   :  { %v714_v63 = vsel %vm680_vm2, %v1475_v56, 0.0 }
 0x2a7   :  { %v1168_v58 = vpop.f32.mrb[20].mxu0  ;;  %709 = vadd.xlane.f32.xlu1 %v708_v57  ;;  %v711_v59 = vsel %vm680_vm2, %v1473_v55, 0.0 }
 0x2a8   :  { %v661_v60 = vpop.f32.mrb[21].mxu0  ;;  %712 = vadd.xlane.f32.xlu0 %v711_v59  ;;  %v1483_v62 = vadd.f32 %v1168_v58, %v486_v21 }
 0x2a9   :  { %v1481_v61 = vadd.f32 %v661_v60, %v486_v21 }
 0x2aa   :  { %v720_v5 = vsel %vm680_vm2, %v1483_v62, 0.0 }
 0x2ab   :  { %v1171_v0 = vpop.f32.mrb[22].mxu0  ;;  %715 = vadd.xlane.f32.xlu1 %v714_v63  ;;  %v717_v1 = vsel %vm680_vm2, %v1481_v61, 0.0 }
 0x2ac   :  { %v671_v2 = vpop.f32.mrb[23].mxu0  ;;  %718 = vadd.xlane.f32.xlu0 %v717_v1  ;;  %v1491_v4 = vadd.f32 %v1171_v0, %v486_v21 }
 0x2ad   :  { %v1489_v3 = vadd.f32 %v671_v2, %v486_v21 }
 0x2ae   :  { %v726_v7 = vsel %vm680_vm2, %v1491_v4, 0.0 }
 0x2af   :  { %721 = vadd.xlane.f32.xlu1 %v720_v5  ;;  %v723_v6 = vsel %vm680_vm2, %v1489_v3, 0.0 }
 0x2b0   :  { %724 = vadd.xlane.f32.xlu0 %v723_v6 }
 0x2b3   :  { %727 = vadd.xlane.f32.xlu1 %v726_v7 }
 0x320   :  { %v686_v8 = vpop.xlane.xlu0 %685 }
 0x321   :  { %v731_v9 = vmul.f32 0.03125, %v686_v8 }
 0x323   :  { %v1500_v10 = vsub.f32 %v1435_v23, %v731_v9 }
 0x324   :  { %v692_v11 = vpop.xlane.xlu1 %691  ;;  %v683_v12 = vpop.xlane.xlu0 %682 }
 0x325   :  { %v733_v13 = vmul.f32 0.03125, %v692_v11  ;;  %v730_v14 = vmul.f32 0.03125, %v683_v12  ;;  %v763_v15 = vmul.f32 %v1500_v10, %v1500_v10 }
 0x327   :  { %v1505_v16 = vsub.f32 %v1441_v28, %v733_v13  ;;  %v1508_v17 = vsub.f32 %v1437_v25, %v730_v14  ;;  %v781_v18 = vsel %vm680_vm2, %v763_v15, 0.0 }
 0x328   :  { %782 = vadd.xlane.f32.xlu1 %v781_v18  ;;  %v689_v19 = vpop.xlane.xlu1 %688 }
 0x329   :  { %v732_v20 = vmul.f32 0.03125, %v689_v19  ;;  %v695_v21 = vpop.xlane.xlu0 %694  ;;  %v765_v22 = vmul.f32 %v1505_v16, %v1505_v16  ;;  %v762_v23 = vmul.f32 %v1508_v17, %v1508_v17 }
 0x32a   :  { %v734_v24 = vmul.f32 0.03125, %v695_v21 }
 0x32b   :  { %v1516_v26 = vsub.f32 %v1443_v30, %v732_v20  ;;  %v787_v27 = vsel %vm680_vm2, %v765_v22, 0.0  ;;  %v778_v25 = vsel %vm680_vm2, %v762_v23, 0.0 }
 0x32c   :  { %v1521_v28 = vsub.f32 %v1449_v35, %v734_v24  ;;  %788 = vadd.xlane.f32.xlu1 %v787_v27  ;;  %v698_v29 = vpop.xlane.xlu1 %697  ;;  %779 = vadd.xlane.f32.xlu0 %v778_v25 }
 0x32d   :  { %v735_v31 = vmul.f32 0.03125, %v698_v29  ;;  %v701_v32 = vpop.xlane.xlu0 %700  ;;  %v764_v33 = vmul.f32 %v1516_v26, %v1516_v26 }
 0x32e   :  { %v736_v34 = vmul.f32 0.03125, %v701_v32  ;;  %v766_v38 = vmul.f32 %v1521_v28, %v1521_v28 }
 0x32f   :  { %v1526_v37 = vsub.f32 %v1451_v36, %v735_v31  ;;  %v784_v30 = vsel %vm680_vm2, %v764_v33, 0.0 }
 0x330   :  { %v1532_v35 = vsub.f32 %v1457_v42, %v736_v34  ;;  %v704_v39 = vpop.xlane.xlu1 %703  ;;  %785 = vadd.xlane.f32.xlu0 %v784_v30  ;;  %v790_v51 = vsel %vm680_vm2, %v766_v38, 0.0 }
 0x331   :  { %v737_v40 = vmul.f32 0.03125, %v704_v39  ;;  %v707_v45 = vpop.xlane.xlu0 %706  ;;  %v767_v46 = vmul.f32 %v1526_v37, %v1526_v37 }
 0x332   :  { %v738_v47 = vmul.f32 0.03125, %v707_v45  ;;  %v768_v52 = vmul.f32 %v1532_v35, %v1532_v35 }
 0x333   :  { %v1537_v48 = vsub.f32 %v1459_v44, %v737_v40  ;;  %v793_v36 = vsel %vm680_vm2, %v767_v46, 0.0 }
 0x334   :  { %v1544_v42 = vsub.f32 %v1465_v49, %v738_v47  ;;  %794 = vadd.xlane.f32.xlu1 %v793_v36  ;;  %v710_v53 = vpop.xlane.xlu1 %709  ;;  %791 = vadd.xlane.f32.xlu0 %v790_v51  ;;  %v796_v63 = vsel %vm680_vm2, %v768_v52, 0.0  ;;  %v892_v51 = vsub.s32 3, %v1384_v41 }
 0x335   :  { %v739_v54 = vmul.f32 0.03125, %v710_v53  ;;  %v713_v57 = vpop.xlane.xlu0 %712  ;;  %v769_v58 = vmul.f32 %v1537_v48, %v1537_v48  ;;  %v912_v53 = vsub.s32 4, %v1384_v41 }
 0x336   :  { %v740_v44 = vmul.f32 0.03125, %v713_v57  ;;  %v770_v49 = vmul.f32 %v1544_v42, %v1544_v42 }
 0x337   :  { %v1549_v59 = vsub.f32 %v1467_v50, %v739_v54  ;;  %v799_v60 = vsel %vm680_vm2, %v769_v58, 0.0 }
 0x338   :  { %v1556_v0 = vsub.f32 %v1473_v55, %v740_v44  ;;  %800 = vadd.xlane.f32.xlu1 %v799_v60  ;;  %v716_v1 = vpop.xlane.xlu1 %715  ;;  %797 = vadd.xlane.f32.xlu0 %v796_v63  ;;  %v802_v9 = vsel %vm680_vm2, %v770_v49, 0.0  ;;  %v1598_v60 = vrot.slane %v1390_v43, %v892_v51 }
 0x339   :  { %v741_v2 = vmul.f32 0.03125, %v716_v1  ;;  %v719_v5 = vpop.xlane.xlu0 %718  ;;  %v771_v6 = vmul.f32 %v1549_v59, %v1549_v59 }
 0x33a   :  { %v742_v50 = vmul.f32 0.03125, %v719_v5  ;;  %v772_v55 = vmul.f32 %v1556_v0, %v1556_v0 }
 0x33b   :  { %v1561_v7 = vsub.f32 %v1475_v56, %v741_v2  ;;  %v805_v8 = vsel %vm680_vm2, %v771_v6, 0.0  ;;  %v1601_v2 = vrot.slane %v1390_v43, %v912_v53 }
 0x33c   :  { %v1568_v11 = vsub.f32 %v1481_v61, %v742_v50  ;;  %806 = vadd.xlane.f32.xlu1 %v805_v8  ;;  %v722_v12 = vpop.xlane.xlu1 %721  ;;  %803 = vadd.xlane.f32.xlu0 %v802_v9  ;;  %v808_v20 = vsel %vm680_vm2, %v772_v55, 0.0 }
 0x33d   :  { %v743_v13 = vmul.f32 0.03125, %v722_v12  ;;  %v725_v14 = vpop.xlane.xlu0 %724  ;;  %v773_v15 = vmul.f32 %v1561_v7, %v1561_v7 }
 0x33e   :  { %v744_v56 = vmul.f32 0.03125, %v725_v14  ;;  %v774_v61 = vmul.f32 %v1568_v11, %v1568_v11 }
 0x33f   :  { %v1573_v18 = vsub.f32 %v1483_v62, %v743_v13  ;;  %v811_v19 = vsel %vm680_vm2, %v773_v15, 0.0 }
 0x340   :  { %v1580_v21 = vsub.f32 %v1489_v3, %v744_v56  ;;  %812 = vadd.xlane.f32.xlu1 %v811_v19  ;;  %v728_v22 = vpop.xlane.xlu1 %727  ;;  %809 = vadd.xlane.f32.xlu0 %v808_v20  ;;  %v814_v25 = vsel %vm680_vm2, %v774_v61, 0.0 }
 0x341   :  { %v745_v23 = vmul.f32 0.03125, %v728_v22  ;;  %v775_v24 = vmul.f32 %v1573_v18, %v1573_v18 }
 0x342   :  { %v776_v29 = vmul.f32 %v1580_v21, %v1580_v21 }
 0x343   :  { %v1585_v62 = vsub.f32 %v1491_v4, %v745_v23  ;;  %v817_v27 = vsel %vm680_vm2, %v775_v24, 0.0 }
 0x344   :  { %818 = vadd.xlane.f32.xlu1 %v817_v27  ;;  %815 = vadd.xlane.f32.xlu0 %v814_v25  ;;  %v820_v32 = vsel %vm680_vm2, %v776_v29, 0.0 }
 0x345   :  { %v777_v3 = vmul.f32 %v1585_v62, %v1585_v62 }
 0x347   :  { %v823_v31 = vsel %vm680_vm2, %v777_v3, 0.0 }
 0x348   :  { %824 = vadd.xlane.f32.xlu1 %v823_v31  ;;  %821 = vadd.xlane.f32.xlu0 %v820_v32 }
 0x3b5   :  { %v783_v4 = vpop.xlane.xlu1 %782 }
 0x3b6   :  { %v827_v33 = vmul.f32 0.03125, %v783_v4 }
 0x3b8   :  { %v843_v34 = vadd.f32 1e-05, %v827_v33 }
 0x3b9   :  { %v789_v30 = vpop.xlane.xlu1 %788  ;;  %v780_v38 = vpop.xlane.xlu0 %779 }
 0x3ba   :  { %1210 = vrsqrt.f32 %v843_v34  ;;  %v829_v39 = vmul.f32 0.03125, %v789_v30  ;;  %v826_v40 = vmul.f32 0.03125, %v780_v38 }
 0x3bc   :  { %v845_v45 = vadd.f32 1e-05, %v829_v39  ;;  %v842_v46 = vadd.f32 1e-05, %v826_v40 }
 0x3bd   :  { %v786_v47 = vpop.xlane.xlu0 %785 }
 0x3be   :  { %1212 = vrsqrt.f32 %v845_v45  ;;  %v828_v36 = vmul.f32 0.03125, %v786_v47 }
 0x3bf   :  { %1214 = vrsqrt.f32 %v842_v46 }
 0x3c0   :  { %v844_v52 = vadd.f32 1e-05, %v828_v36 }
 0x3c1   :  { %v795_v54 = vpop.xlane.xlu1 %794  ;;  %v792_v57 = vpop.xlane.xlu0 %791 }
 0x3c2   :  { %1216 = vrsqrt.f32 %v844_v52  ;;  %v831_v58 = vmul.f32 0.03125, %v795_v54  ;;  %v830_v44 = vmul.f32 0.03125, %v792_v57 }
 0x3c4   :  { %v1211_v63 = vpop.eup %1210  ;;  %v847_v49 = vadd.f32 1e-05, %v831_v58  ;;  %v846_v1 = vadd.f32 1e-05, %v830_v44 }
 0x3c5   :  { %v875_v5 = vmul.f32 %v1211_v63, %v1500_v10  ;;  %v801_v6 = vpop.xlane.xlu1 %800  ;;  %v798_v50 = vpop.xlane.xlu0 %797 }
 0x3c6   :  { %1218 = vrsqrt.f32 %v847_v49  ;;  %v833_v41 = vmul.f32 0.03125, %v801_v6  ;;  %v832_v8 = vmul.f32 0.03125, %v798_v50 }
 0x3c7   :  { %v895_v9 = vmul.f32 %v1598_v60, %v875_v5  ;;  %1220 = vrsqrt.f32 %v846_v1 }
 0x3c8   :  { %v1213_v55 = vpop.eup %1212  ;;  %v849_v12 = vadd.f32 1e-05, %v833_v41  ;;  %v848_v13 = vadd.f32 1e-05, %v832_v8 }
 0x3c9   :  { %v1215_v14 = vpop.eup %1214  ;;  %v915_v15 = vadd.f32 %v1601_v2, %v895_v9  ;;  %v877_v56 = vmul.f32 %v1213_v55, %v1505_v16  ;;  %v807_v43 = vpop.xlane.xlu1 %806 }
 0x3ca   :  { %v804_v19 = vpop.xlane.xlu0 %803  ;;  %v874_v10 = vmul.f32 %v1215_v14, %v1508_v17  ;;  %1222 = vrsqrt.f32 %v849_v12  ;;  %v835_v20 = vmul.f32 0.03125, %v807_v43 }
 0x3cb   :  { %v834_v61 = vmul.f32 0.03125, %v804_v19  ;;  %931 = vst.msk [vmem:[%s1720_s5 + $0x8] sm:$0xff] %vm680_vm2, %v915_v15  ;;  %v897_v22 = vmul.f32 %v1598_v60, %v877_v56  ;;  %1224 = vrsqrt.f32 %v848_v13 }
 0x3cc   :  { %v1217_v23 = vpop.eup %1216  ;;  %v894_v24 = vmul.f32 %v1598_v60, %v874_v10  ;;  %v851_v27 = vadd.f32 1e-05, %v835_v20 }
 0x3cd   :  { %v850_v16 = vadd.f32 1e-05, %v834_v61  ;;  %v917_v25 = vadd.f32 %v1601_v2, %v897_v22  ;;  %v876_v17 = vmul.f32 %v1217_v23, %v1516_v26  ;;  %v813_v29 = vpop.xlane.xlu1 %812 }
 0x3ce   :  { %v810_v3 = vpop.xlane.xlu0 %809  ;;  %v914_v31 = vadd.f32 %v1601_v2, %v894_v24  ;;  %1226 = vrsqrt.f32 %v851_v27  ;;  %v837_v32 = vmul.f32 0.03125, %v813_v29 }
 0x3cf   :  { %v836_v4 = vmul.f32 0.03125, %v810_v3  ;;  %933 = vst.msk [vmem:[%s1720_s5 + $0x18] sm:$0xff] %vm680_vm2, %v917_v25  ;;  %v896_v33 = vmul.f32 %v1598_v60, %v876_v17  ;;  %1228 = vrsqrt.f32 %v850_v16 }
 0x3d0   :  { %v1219_v34 = vpop.eup %1218  ;;  %930 = vst.msk [vmem:[%s1720_s5] sm:$0xff] %vm680_vm2, %v914_v31  ;;  %v853_v26 = vadd.f32 1e-05, %v837_v32 }
 0x3d1   :  { %v852_v30 = vadd.f32 1e-05, %v836_v4  ;;  %v1221_v38 = vpop.eup %1220  ;;  %v916_v39 = vadd.f32 %v1601_v2, %v896_v33  ;;  %v879_v40 = vmul.f32 %v1219_v34, %v1526_v37  ;;  %v819_v45 = vpop.xlane.xlu1 %818 }
 0x3d2   :  { %v816_v46 = vpop.xlane.xlu0 %815  ;;  %v878_v47 = vmul.f32 %v1221_v38, %v1521_v28  ;;  %1230 = vrsqrt.f32 %v853_v26  ;;  %v839_v36 = vmul.f32 0.03125, %v819_v45 }
 0x3d3   :  { %v838_v51 = vmul.f32 0.03125, %v816_v46  ;;  %932 = vst.msk [vmem:[%s1720_s5 + $0x10] sm:$0xff] %vm680_vm2, %v916_v39  ;;  %v899_v52 = vmul.f32 %v1598_v60, %v879_v40  ;;  %1232 = vrsqrt.f32 %v852_v30 }
 0x3d4   :  { %v1223_v53 = vpop.eup %1222  ;;  %v898_v54 = vmul.f32 %v1598_v60, %v878_v47  ;;  %v855_v57 = vadd.f32 1e-05, %v839_v36 }
 0x3d5   :  { %v854_v37 = vadd.f32 1e-05, %v838_v51  ;;  %v1225_v58 = vpop.eup %1224  ;;  %v919_v44 = vadd.f32 %v1601_v2, %v899_v52  ;;  %v881_v28 = vmul.f32 %v1223_v53, %v1537_v48  ;;  %v825_v63 = vpop.xlane.xlu1 %824 }
 0x3d6   :  { %v822_v49 = vpop.xlane.xlu0 %821  ;;  %v918_v1 = vadd.f32 %v1601_v2, %v898_v54  ;;  %v880_v5 = vmul.f32 %v1225_v58, %v1532_v35  ;;  %1234 = vrsqrt.f32 %v855_v57  ;;  %v841_v6 = vmul.f32 0.03125, %v825_v63 }
 0x3d7   :  { %935 = vst.msk [vmem:[%s1720_s5 + $0x28] sm:$0xff] %vm680_vm2, %v919_v44  ;;  %v901_v50 = vmul.f32 %v1598_v60, %v881_v28  ;;  %1236 = vrsqrt.f32 %v854_v37  ;;  %v840_v41 = vmul.f32 0.03125, %v822_v49 }
 0x3d8   :  { %v1227_v8 = vpop.eup %1226  ;;  %934 = vst.msk [vmem:[%s1720_s5 + $0x20] sm:$0xff] %vm680_vm2, %v918_v1  ;;  %v900_v48 = vmul.f32 %v1598_v60, %v880_v5  ;;  %v857_v35 = vadd.f32 1e-05, %v841_v6 }
 0x3d9   :  { %v1229_v9 = vpop.eup %1228  ;;  %v921_v55 = vadd.f32 %v1601_v2, %v901_v50  ;;  %v883_v12 = vmul.f32 %v1227_v8, %v1549_v59  ;;  %v856_v13 = vadd.f32 1e-05, %v840_v41 }
 0x3da   :  { %v920_v14 = vadd.f32 %v1601_v2, %v900_v48  ;;  %v882_v15 = vmul.f32 %v1229_v9, %v1544_v42  ;;  %1238 = vrsqrt.f32 %v857_v35 }
 0x3db   :  { %937 = vst.msk [vmem:[%s1720_s5 + $0x38] sm:$0xff] %vm680_vm2, %v921_v55  ;;  %v903_v56 = vmul.f32 %v1598_v60, %v883_v12  ;;  %1240 = vrsqrt.f32 %v856_v13 }
 0x3dc   :  { %v1231_v43 = vpop.eup %1230  ;;  %936 = vst.msk [vmem:[%s1720_s5 + $0x30] sm:$0xff] %vm680_vm2, %v920_v14  ;;  %v902_v59 = vmul.f32 %v1598_v60, %v882_v15 }
 0x3dd   :  { %v1233_v19 = vpop.eup %1232  ;;  %v923_v42 = vadd.f32 %v1601_v2, %v903_v56  ;;  %v885_v10 = vmul.f32 %v1231_v43, %v1561_v7 }
 0x3de   :  { %v922_v20 = vadd.f32 %v1601_v2, %v902_v59  ;;  %v884_v61 = vmul.f32 %v1233_v19, %v1556_v0 }
 0x3df   :  { %939 = vst.msk [vmem:[%s1720_s5 + $0x48] sm:$0xff] %vm680_vm2, %v923_v42  ;;  %v905_v22 = vmul.f32 %v1598_v60, %v885_v10 }
 0x3e0   :  { %v1235_v23 = vpop.eup %1234  ;;  %938 = vst.msk [vmem:[%s1720_s5 + $0x40] sm:$0xff] %vm680_vm2, %v922_v20  ;;  %v904_v24 = vmul.f32 %v1598_v60, %v884_v61 }
 0x3e1   :  { %v1237_v7 = vpop.eup %1236  ;;  %v925_v27 = vadd.f32 %v1601_v2, %v905_v22  ;;  %v887_v0 = vmul.f32 %v1235_v23, %v1573_v18 }
 0x3e2   :  { %v924_v16 = vadd.f32 %v1601_v2, %v904_v24  ;;  %v886_v25 = vmul.f32 %v1237_v7, %v1568_v11 }
 0x3e3   :  { %941 = vst.msk [vmem:[%s1720_s5 + $0x58] sm:$0xff] %vm680_vm2, %v925_v27  ;;  %v907_v17 = vmul.f32 %v1598_v60, %v887_v0 }
 0x3e4   :  { %v1239_v29 = vpop.eup %1238  ;;  %940 = vst.msk [vmem:[%s1720_s5 + $0x50] sm:$0xff] %vm680_vm2, %v924_v16  ;;  %v906_v3 = vmul.f32 %v1598_v60, %v886_v25 }
 0x3e5   :  { %v1241_v18 = vpop.eup %1240  ;;  %v927_v31 = vadd.f32 %v1601_v2, %v907_v17  ;;  %v889_v11 = vmul.f32 %v1239_v29, %v1585_v62 }
 0x3e6   :  { %v926_v32 = vadd.f32 %v1601_v2, %v906_v3  ;;  %v888_v4 = vmul.f32 %v1241_v18, %v1580_v21 }
 0x3e7   :  { %943 = vst.msk [vmem:[%s1720_s5 + $0x68] sm:$0xff] %vm680_vm2, %v927_v31  ;;  %v909_v33 = vmul.f32 %v1598_v60, %v889_v11 }
 0x3e8   :  { %942 = vst.msk [vmem:[%s1720_s5 + $0x60] sm:$0xff] %vm680_vm2, %v926_v32  ;;  %v908_v34 = vmul.f32 %v1598_v60, %v888_v4 }
 0x3e9   :  { %v929_v62 = vadd.f32 %v1601_v2, %v909_v33 }
 0x3ea   :  { %v928_v26 = vadd.f32 %v1601_v2, %v908_v34 }
 0x3eb   :  { %945 = vst.msk [vmem:[%s1720_s5 + $0x78] sm:$0xff] %vm680_vm2, %v929_v62 }
 0x3ec   :  { %944 = vst.msk [vmem:[%s1720_s5 + $0x70] sm:$0xff] %vm680_vm2, %v928_v26 }

// kernel: _lambda_.3
= control target key start
LH: loop header
LB: loop body
LE: loop exit
PB: predicated region body
PF: predicated region fallthrough
CT: control target
= control target key end

     0   :  { %vm58_vm0 = vcmask 64512   ;;  %v54_v57 = vlaneseq  ;;  %vm424_vm1 = vcmask 523264   ;;  %vm1111_vm2 = vcmask 261120   ;;  %s3073_s1 = inlined_call_operand.vmem [shape: f32[8,64], index: 1, kind: input, shape index: {}]   ;;  %s3074_s0 = inlined_call_operand.vmem [shape: f32[256,8], index: 0, kind: input, shape index: {}]   ;;  %s3075_s2 = inlined_call_operand.vmem [shape: f32[64,64], index: 2, kind: input, shape index: {}]   ;;  %s3076_s3 = inlined_call_operand.vmem [shape: f32[64,32], index: 3, kind: input, shape index: {}]   ;;  %s3077_s4 = inlined_call_operand.vmem [shape: f32[5,64], index: 4, kind: input, shape index: {}]   ;;  %s3078_s5 = inlined_call_operand.vmem [shape: f32[256,32], index: 5, kind: output, shape index: {}]  }
   0x1   :  { %v53_v0 = vld [vmem:[%s3073_s1] sm:$0xff]  ;;  %v22_v2 = vld [vmem:[%s3074_s0 + $0x8] sm:$0xff]  ;;  %v23_v3 = vld [vmem:[%s3074_s0 + $0x10] sm:$0xff] }
   0x2   :  { %v21_v1 = vld [vmem:[%s3074_s0] sm:$0xff]  ;;  %1846 = vmatprep.subr.mxu0 %v53_v0  ;;  %2056 = vmatprep.subr.mxu1 %v53_v0  ;;  %v24_v4 = vld [vmem:[%s3074_s0 + $0x18] sm:$0xff]  ;;  %v38_v7 = vld [vmem:[%s3074_s0 + $0x88] sm:$0xff]  ;;  %v2332_v58 = vshrl.u32 %v54_v57, 7 }
   0x3   :  { %1848 = vmatprep.mubr.msk.f32.mxu0 %vm58_vm0, %v21_v1  ;;  %1847 = vmatpush3.msra.mxu0 %v53_v0  ;;  %v25_v5 = vld [vmem:[%s3074_s0 + $0x20] sm:$0xff]  ;;  %v39_v8 = vld [vmem:[%s3074_s0 + $0x90] sm:$0xff]  ;;  %v26_v9 = vld [vmem:[%s3074_s0 + $0x28] sm:$0xff] }
   0x4   :  { %1849 = vmatmul.mubr.msk.f32.vlgmr.msra.gmra.mrb[0].mxu0 %vm58_vm0, %v22_v2  ;;  %2057 = vmatpush3.msra.mxu1 %v53_v0  ;;  %v37_v6 = vld [vmem:[%s3074_s0 + $0x80] sm:$0xff]  ;;  %v40_v10 = vld [vmem:[%s3074_s0 + $0x98] sm:$0xff]  ;;  %v27_v11 = vld [vmem:[%s3074_s0 + $0x30] sm:$0xff]  ;;  %v56_v59 = vsub.s32 0, %v2332_v58 }
   0x5   :  { %1851 = vmatprep.mubr.msk.f32.mxu0 %vm58_vm0, %v23_v3  ;;  %1872 = vmatprep.mubr.msk.f32.mxu1 %vm58_vm0, %v37_v6  ;;  %v41_v12 = vld [vmem:[%s3074_s0 + $0xa0] sm:$0xff]  ;;  %v413_v14 = vld [vmem:[%s3075_s2 + $0x8] sm:$0xff]  ;;  %v414_v15 = vld [vmem:[%s3075_s2 + $0x10] sm:$0xff] }
   0x6   :  { %1873 = vmatmul.mubr.msk.f32.vlgmr.msra.gmra.mrb[0].mxu1 %vm58_vm0, %v38_v7  ;;  %v412_v13 = vld [vmem:[%s3075_s2] sm:$0xff]  ;;  %v28_v16 = vld [vmem:[%s3074_s0 + $0x38] sm:$0xff]  ;;  %v42_v17 = vld [vmem:[%s3074_s0 + $0xa8] sm:$0xff] }
   0x7   :  { %1875 = vmatprep.mubr.msk.f32.mxu1 %vm58_vm0, %v39_v8  ;;  %v2024_v18 = vpack.c.bf16 %v413_v14, %v412_v13  ;;  %v415_v19 = vld [vmem:[%s3075_s2 + $0x18] sm:$0xff]  ;;  %v29_v20 = vld [vmem:[%s3074_s0 + $0x40] sm:$0xff]  ;;  %v43_v21 = vld [vmem:[%s3074_s0 + $0xb0] sm:$0xff] }
   0x8   :  { %1852 = vmatmul.mubr.msk.f32.gmra.mrb[2].mxu0 %vm58_vm0, %v24_v4  ;;  %v2028_v22 = vpack.c.bf16 %v415_v19, %v414_v15  ;;  %v416_v23 = vld [vmem:[%s3075_s2 + $0x20] sm:$0xff]  ;;  %v417_v24 = vld [vmem:[%s3075_s2 + $0x28] sm:$0xff]  ;;  %v44_v26 = vld [vmem:[%s3074_s0 + $0xb8] sm:$0xff] }
   0x9   :  { %1854 = vmatprep.mubr.msk.f32.mxu0 %vm58_vm0, %v25_v5  ;;  %2025 = vmatprep.subr.bf16.mxu1 %v2024_v18  ;;  %v30_v25 = vld [vmem:[%s3074_s0 + $0x48] sm:$0xff]  ;;  %v31_v27 = vld [vmem:[%s3074_s0 + $0x50] sm:$0xff]  ;;  %v45_v28 = vld [vmem:[%s3074_s0 + $0xc0] sm:$0xff]  ;;  %v2032_v29 = vpack.c.bf16 %v417_v24, %v416_v23 }
   0xa   :  { %1876 = vmatmul.mubr.msk.f32.gmra.mrb[2].mxu1 %vm58_vm0, %v40_v10  ;;  %v418_v30 = vld [vmem:[%s3075_s2 + $0x30] sm:$0xff]  ;;  %v419_v31 = vld [vmem:[%s3075_s2 + $0x38] sm:$0xff]  ;;  %v46_v33 = vld [vmem:[%s3074_s0 + $0xc8] sm:$0xff] }
   0xb   :  { %1878 = vmatprep.mubr.msk.f32.mxu1 %vm58_vm0, %v41_v12  ;;  %2027 = vmatpush3.bf16.msra.mxu1 %v2024_v18  ;;  %v32_v32 = vld [vmem:[%s3074_s0 + $0x58] sm:$0xff]  ;;  %v33_v34 = vld [vmem:[%s3074_s0 + $0x60] sm:$0xff]  ;;  %v47_v35 = vld [vmem:[%s3074_s0 + $0xd0] sm:$0xff]  ;;  %v2036_v36 = vpack.c.bf16 %v419_v31, %v418_v30 }
   0xc   :  { %1855 = vmatmul.mubr.msk.f32.gmra.mrb[4].mxu0 %vm58_vm0, %v26_v9  ;;  %2029 = vmatprep.subr.bf16.mxu1 %v2028_v22  ;;  %v34_v37 = vld [vmem:[%s3074_s0 + $0x68] sm:$0xff]  ;;  %v48_v38 = vld [vmem:[%s3074_s0 + $0xd8] sm:$0xff]  ;;  %v35_v39 = vld [vmem:[%s3074_s0 + $0x70] sm:$0xff] }
   0xd   :  { %1857 = vmatprep.mubr.msk.f32.mxu0 %vm58_vm0, %v27_v11  ;;  %v49_v40 = vld [vmem:[%s3074_s0 + $0xe0] sm:$0xff]  ;;  %v36_v41 = vld [vmem:[%s3074_s0 + $0x78] sm:$0xff]  ;;  %v50_v42 = vld [vmem:[%s3074_s0 + $0xe8] sm:$0xff] }
   0xe   :  { %1879 = vmatmul.mubr.msk.f32.gmra.mrb[4].mxu1 %vm58_vm0, %v42_v17  ;;  %v51_v43 = vld [vmem:[%s3074_s0 + $0xf0] sm:$0xff]  ;;  %v52_v44 = vld [vmem:[%s3074_s0 + $0xf8] sm:$0xff]  ;;  %v778_v45 = vld [vmem:[%s3076_s3] sm:$0xff] }
   0xf   :  { %1881 = vmatprep.mubr.msk.f32.mxu1 %vm58_vm0, %v43_v21  ;;  %2031 = vmatpush3.bf16.msra.mxu1 %v2028_v22  ;;  %v779_v46 = vld [vmem:[%s3076_s3 + $0x8] sm:$0xff]  ;;  %v780_v47 = vld [vmem:[%s3076_s3 + $0x10] sm:$0xff]  ;;  %v781_v49 = vld [vmem:[%s3076_s3 + $0x18] sm:$0xff] }
  0x10   :  { %1858 = vmatmul.mubr.msk.f32.gmra.mrb[6].mxu0 %vm58_vm0, %v28_v16  ;;  %2033 = vmatprep.subr.bf16.mxu1 %v2032_v29  ;;  %v2040_v48 = vpack.c.bf16 %v779_v46, %v778_v45  ;;  %v2044_v50 = vpack.c.bf16 %v781_v49, %v780_v47  ;;  %v782_v51 = vld [vmem:[%s3076_s3 + $0x20] sm:$0xff]  ;;  %v783_v52 = vld [vmem:[%s3076_s3 + $0x28] sm:$0xff]  ;;  %v784_v54 = vld [vmem:[%s3076_s3 + $0x30] sm:$0xff] }
  0x11   :  { %1860 = vmatprep.mubr.msk.f32.mxu0 %vm58_vm0, %v29_v20  ;;  %v2048_v53 = vpack.c.bf16 %v783_v52, %v782_v51  ;;  %v785_v55 = vld [vmem:[%s3076_s3 + $0x38] sm:$0xff]  ;;  %v2338_v60 = vld [vmem:[%s3077_s4] sm:$0x1f] }
  0x12   :  { %1882 = vmatmul.mubr.msk.f32.gmra.mrb[6].mxu1 %vm58_vm0, %v44_v26  ;;  %2041 = vmatprep.subr.bf16.mxu0 %v2040_v48  ;;  %v2052_v56 = vpack.c.bf16 %v785_v55, %v784_v54  ;;  %v2341_v61 = vrot.slane %v2338_v60, %v56_v59 }
  0x13   :  { %1884 = vmatprep.mubr.msk.f32.mxu1 %vm58_vm0, %v45_v28  ;;  %2035 = vmatpush3.bf16.msra.mxu1 %v2032_v29 }
  0x14   :  { %1861 = vmatmul.mubr.msk.f32.gmra.mrb[8].mxu0 %vm58_vm0, %v30_v25  ;;  %2037 = vmatprep.subr.bf16.mxu1 %v2036_v36 }
  0x15   :  { %1863 = vmatprep.mubr.msk.f32.mxu0 %vm58_vm0, %v31_v27  ;;  %2043 = vmatpush3.bf16.msra.mxu0 %v2040_v48 }
  0x16   :  { %1885 = vmatmul.mubr.msk.f32.gmra.mrb[8].mxu1 %vm58_vm0, %v46_v33  ;;  %2045 = vmatprep.subr.bf16.mxu0 %v2044_v50 }
  0x17   :  { %1887 = vmatprep.mubr.msk.f32.mxu1 %vm58_vm0, %v47_v35  ;;  %2039 = vmatpush3.bf16.msra.mxu1 %v2036_v36 }
  0x18   :  { %1864 = vmatmul.mubr.msk.f32.gmra.mrb[10].mxu0 %vm58_vm0, %v32_v32 }
  0x19   :  { %1866 = vmatprep.mubr.msk.f32.mxu0 %vm58_vm0, %v33_v34  ;;  %2047 = vmatpush3.bf16.msra.mxu0 %v2044_v50 }
  0x1a   :  { %1888 = vmatmul.mubr.msk.f32.gmra.mrb[10].mxu1 %vm58_vm0, %v48_v38  ;;  %2049 = vmatprep.subr.bf16.mxu0 %v2048_v53 }
  0x1b   :  { %1890 = vmatprep.mubr.msk.f32.mxu1 %vm58_vm0, %v49_v40 }
  0x1c   :  { %1867 = vmatmul.mubr.msk.f32.gmra.mrb[12].mxu0 %vm58_vm0, %v34_v37 }
  0x1d   :  { %1869 = vmatprep.mubr.msk.f32.mxu0 %vm58_vm0, %v35_v39  ;;  %2051 = vmatpush3.bf16.msra.mxu0 %v2048_v53 }
  0x1e   :  { %1891 = vmatmul.mubr.msk.f32.gmra.mrb[12].mxu1 %vm58_vm0, %v50_v42  ;;  %2053 = vmatprep.subr.bf16.mxu0 %v2052_v56 }
  0x1f   :  { %1893 = vmatprep.mubr.msk.f32.mxu1 %vm58_vm0, %v51_v43 }
  0x20   :  { %1870 = vmatmul.mubr.msk.f32.gmra.mrb[14].mxu0 %vm58_vm0, %v36_v41 }
  0x21   :  { %2055 = vmatpush3.bf16.msra.mxu0 %v2052_v56 }
  0x22   :  { %1894 = vmatmul.mubr.msk.f32.gmra.mrb[14].mxu1 %vm58_vm0, %v52_v44 }
  0xd7   :  { %v1850_v62 = vpop.f32.mrb[0].mxu0 }
  0xd8   :  { %v227_v63 = vadd.f32 %v1850_v62, %v2341_v61  ;;  %v221_v0 = vpop.f32.mrb[1].mxu0 }
  0xd9   :  { %v222_v1 = vadd.f32 %v221_v0, %v2341_v61  ;;  %v2345_v4 = vpop.f32.mrb[0].mxu1 }
  0xda   :  { %v381_v5 = vmax.f32 %v227_v63, 0.0  ;;  %v301_v8 = vpop.f32.mrb[1].mxu1  ;;  %v307_v63 = vadd.f32 %v2345_v4, %v2341_v61 }
  0xdb   :  { %v380_v2 = vmax.f32 %v222_v1, 0.0  ;;  %v1853_v3 = vpop.f32.mrb[2].mxu0  ;;  %v302_v53 = vadd.f32 %v301_v8, %v2341_v61 }
  0xdc   :  { %v237_v6 = vadd.f32 %v1853_v3, %v2341_v61  ;;  %v231_v7 = vpop.f32.mrb[3].mxu0 }
  0xdd   :  { %v232_v9 = vadd.f32 %v231_v7, %v2341_v61  ;;  %1912 = vmatprep.mubr.msk.f32.mxu1 %vm424_vm1, %v380_v2  ;;  %v2351_v12 = vpop.f32.mrb[2].mxu1  ;;  %v396_v1 = vmax.f32 %v302_v53, 0.0 }
  0xde   :  { %1913 = vmatmul.mubr.msk.f32.vlgmr.msra.gmra.mrb[16].mxu1 %vm424_vm1, %v381_v5  ;;  %v383_v13 = vmax.f32 %v237_v6, 0.0  ;;  %v311_v16 = vpop.f32.mrb[3].mxu1  ;;  %v397_v6 = vmax.f32 %v307_v63, 0.0  ;;  %v317_v7 = vadd.f32 %v2351_v12, %v2341_v61 }
  0xdf   :  { %v382_v10 = vmax.f32 %v232_v9, 0.0  ;;  %v1856_v11 = vpop.f32.mrb[4].mxu0  ;;  %v312_v2 = vadd.f32 %v311_v16, %v2341_v61 }
  0xe0   :  { %v247_v14 = vadd.f32 %v1856_v11, %v2341_v61  ;;  %v241_v15 = vpop.f32.mrb[5].mxu0  ;;  %v399_v4 = vmax.f32 %v317_v7, 0.0 }
  0xe1   :  { %v242_v17 = vadd.f32 %v241_v15, %v2341_v61  ;;  %1915 = vmatprep.mubr.msk.f32.mxu1 %vm424_vm1, %v382_v10  ;;  %v2357_v21 = vpop.f32.mrb[4].mxu1  ;;  %v398_v8 = vmax.f32 %v312_v2, 0.0 }
  0xe2   :  { %v385_v18 = vmax.f32 %v247_v14, 0.0  ;;  %1916 = vmatmul.mubr.msk.f32.gmra.mrb[18].mxu1 %vm424_vm1, %v383_v13  ;;  %v321_v24 = vpop.f32.mrb[5].mxu1  ;;  %v327_v10 = vadd.f32 %v2357_v21, %v2341_v61 }
  0xe3   :  { %v384_v19 = vmax.f32 %v242_v17, 0.0  ;;  %v1859_v20 = vpop.f32.mrb[6].mxu0  ;;  %v322_v9 = vadd.f32 %v321_v24, %v2341_v61 }
  0xe4   :  { %v257_v22 = vadd.f32 %v1859_v20, %v2341_v61  ;;  %v251_v23 = vpop.f32.mrb[7].mxu0  ;;  %v401_v14 = vmax.f32 %v327_v10, 0.0 }
  0xe5   :  { %v252_v25 = vadd.f32 %v251_v23, %v2341_v61  ;;  %1918 = vmatprep.mubr.msk.f32.mxu1 %vm424_vm1, %v384_v19  ;;  %v1883_v29 = vpop.f32.mrb[6].mxu1  ;;  %v400_v11 = vmax.f32 %v322_v9, 0.0 }
  0xe6   :  { %v387_v26 = vmax.f32 %v257_v22, 0.0  ;;  %1919 = vmatmul.mubr.msk.f32.gmra.mrb[20].mxu1 %vm424_vm1, %v385_v18  ;;  %v331_v32 = vpop.f32.mrb[7].mxu1  ;;  %v337_v12 = vadd.f32 %v1883_v29, %v2341_v61 }
  0xe7   :  { %v386_v27 = vmax.f32 %v252_v25, 0.0  ;;  %v1862_v28 = vpop.f32.mrb[8].mxu0  ;;  %v332_v13 = vadd.f32 %v331_v32, %v2341_v61 }
  0xe8   :  { %v267_v30 = vadd.f32 %v1862_v28, %v2341_v61  ;;  %v261_v31 = vpop.f32.mrb[9].mxu0  ;;  %v403_v17 = vmax.f32 %v337_v12, 0.0 }
  0xe9   :  { %v262_v33 = vadd.f32 %v261_v31, %v2341_v61  ;;  %1921 = vmatprep.mubr.msk.f32.mxu1 %vm424_vm1, %v386_v27  ;;  %v1886_v37 = vpop.f32.mrb[8].mxu1  ;;  %v402_v15 = vmax.f32 %v332_v13, 0.0 }
  0xea   :  { %v389_v34 = vmax.f32 %v267_v30, 0.0  ;;  %1922 = vmatmul.mubr.msk.f32.gmra.mrb[22].mxu1 %vm424_vm1, %v387_v26  ;;  %v341_v40 = vpop.f32.mrb[9].mxu1  ;;  %v347_v18 = vadd.f32 %v1886_v37, %v2341_v61 }
  0xeb   :  { %v388_v35 = vmax.f32 %v262_v33, 0.0  ;;  %v1865_v36 = vpop.f32.mrb[10].mxu0  ;;  %v342_v16 = vadd.f32 %v341_v40, %v2341_v61  ;;  %v422_v33 = vsub.s32 1, %v2332_v58 }
  0xec   :  { %v277_v38 = vadd.f32 %v1865_v36, %v2341_v61  ;;  %v271_v39 = vpop.f32.mrb[11].mxu0  ;;  %v405_v21 = vmax.f32 %v347_v18, 0.0 }
  0xed   :  { %v272_v41 = vadd.f32 %v271_v39, %v2341_v61  ;;  %1924 = vmatprep.mubr.msk.f32.mxu1 %vm424_vm1, %v388_v35  ;;  %v1889_v45 = vpop.f32.mrb[10].mxu1  ;;  %v404_v19 = vmax.f32 %v342_v16, 0.0 }
  0xee   :  { %v391_v42 = vmax.f32 %v277_v38, 0.0  ;;  %1925 = vmatmul.mubr.msk.f32.gmra.mrb[24].mxu1 %vm424_vm1, %v389_v34  ;;  %v351_v48 = vpop.f32.mrb[11].mxu1  ;;  %v357_v22 = vadd.f32 %v1889_v45, %v2341_v61  ;;  %v2418_v34 = vrot.slane %v2338_v60, %v422_v33 }
  0xef   :  { %v390_v43 = vmax.f32 %v272_v41, 0.0  ;;  %v1868_v44 = vpop.f32.mrb[12].mxu0  ;;  %v352_v20 = vadd.f32 %v351_v48, %v2341_v61 }
  0xf0   :  { %v287_v46 = vadd.f32 %v1868_v44, %v2341_v61  ;;  %v281_v47 = vpop.f32.mrb[13].mxu0  ;;  %v407_v25 = vmax.f32 %v357_v22, 0.0 }
  0xf1   :  { %v282_v49 = vadd.f32 %v281_v47, %v2341_v61  ;;  %1927 = vmatprep.mubr.msk.f32.mxu1 %vm424_vm1, %v390_v43  ;;  %v1892_v54 = vpop.f32.mrb[12].mxu1  ;;  %v406_v23 = vmax.f32 %v352_v20, 0.0 }
  0xf2   :  { %v393_v50 = vmax.f32 %v287_v46, 0.0  ;;  %1928 = vmatmul.mubr.msk.f32.gmra.mrb[26].mxu1 %vm424_vm1, %v391_v42  ;;  %v361_v57 = vpop.f32.mrb[13].mxu1  ;;  %v367_v26 = vadd.f32 %v1892_v54, %v2341_v61 }
  0xf3   :  { %v392_v51 = vmax.f32 %v282_v49, 0.0  ;;  %v1871_v52 = vpop.f32.mrb[14].mxu0  ;;  %v362_v24 = vadd.f32 %v361_v57, %v2341_v61 }
  0xf4   :  { %v297_v55 = vadd.f32 %v1871_v52, %v2341_v61  ;;  %v291_v56 = vpop.f32.mrb[15].mxu0  ;;  %v409_v29 = vmax.f32 %v367_v26, 0.0 }
  0xf5   :  { %v292_v59 = vadd.f32 %v291_v56, %v2341_v61  ;;  %1930 = vmatprep.mubr.msk.f32.mxu1 %vm424_vm1, %v392_v51  ;;  %v1895_v3 = vpop.f32.mrb[14].mxu1  ;;  %v408_v27 = vmax.f32 %v362_v24, 0.0 }
  0xf6   :  { %v395_v62 = vmax.f32 %v297_v55, 0.0  ;;  %1931 = vmatmul.mubr.msk.f32.gmra.mrb[28].mxu1 %vm424_vm1, %v393_v50  ;;  %v371_v5 = vpop.f32.mrb[15].mxu1  ;;  %v377_v30 = vadd.f32 %v1895_v3, %v2341_v61 }
  0xf7   :  { %v394_v0 = vmax.f32 %v292_v59, 0.0  ;;  %v372_v28 = vadd.f32 %v371_v5, %v2341_v61 }
  0xf8   :  { %v411_v32 = vmax.f32 %v377_v30, 0.0 }
  0xf9   :  { %1933 = vmatprep.mubr.msk.f32.mxu1 %vm424_vm1, %v394_v0  ;;  %v410_v31 = vmax.f32 %v372_v28, 0.0 }
  0xfa   :  { %1934 = vmatmul.mubr.msk.f32.gmra.mrb[30].mxu1 %vm424_vm1, %v395_v62 }
  0xfb   :  { %1936 = vmatprep.mubr.msk.f32.mxu1 %vm424_vm1, %v396_v1 }
  0xfe   :  { %1937 = vmatmul.mubr.msk.f32.gmra.mrb[32].mxu1 %vm424_vm1, %v397_v6 }
  0xff   :  { %1939 = vmatprep.mubr.msk.f32.mxu1 %vm424_vm1, %v398_v8 }
 0x102   :  { %1940 = vmatmul.mubr.msk.f32.gmra.mrb[34].mxu1 %vm424_vm1, %v399_v4 }
 0x103   :  { %1942 = vmatprep.mubr.msk.f32.mxu1 %vm424_vm1, %v400_v11 }
 0x106   :  { %1943 = vmatmul.mubr.msk.f32.gmra.mrb[36].mxu1 %vm424_vm1, %v401_v14 }
 0x107   :  { %1945 = vmatprep.mubr.msk.f32.mxu1 %vm424_vm1, %v402_v15 }
 0x10a   :  { %1946 = vmatmul.mubr.msk.f32.gmra.mrb[38].mxu1 %vm424_vm1, %v403_v17 }
 0x10b   :  { %1948 = vmatprep.mubr.msk.f32.mxu1 %vm424_vm1, %v404_v19 }
 0x10e   :  { %1949 = vmatmul.mubr.msk.f32.gmra.mrb[40].mxu1 %vm424_vm1, %v405_v21 }
 0x10f   :  { %1951 = vmatprep.mubr.msk.f32.mxu1 %vm424_vm1, %v406_v23 }
 0x112   :  { %1952 = vmatmul.mubr.msk.f32.gmra.mrb[42].mxu1 %vm424_vm1, %v407_v25 }
 0x113   :  { %1954 = vmatprep.mubr.msk.f32.mxu1 %vm424_vm1, %v408_v27 }
 0x116   :  { %1955 = vmatmul.mubr.msk.f32.gmra.mrb[44].mxu1 %vm424_vm1, %v409_v29 }
 0x117   :  { %1957 = vmatprep.mubr.msk.f32.mxu1 %vm424_vm1, %v410_v31 }
 0x11a   :  { %1958 = vmatmul.mubr.msk.f32.gmra.mrb[46].mxu1 %vm424_vm1, %v411_v32 }
 0x1b1   :  { %v1914_v35 = vpop.f32.mrb[16].mxu1 }
 0x1b2   :  { %v593_v36 = vadd.f32 %v1914_v35, %v2418_v34  ;;  %v587_v37 = vpop.f32.mrb[17].mxu1 }
 0x1b3   :  { %v588_v61 = vadd.f32 %v587_v37, %v2418_v34 }
 0x1b4   :  { %v747_v40 = vmax.f32 %v593_v36, 0.0 }
 0x1b5   :  { %v746_v38 = vmax.f32 %v588_v61, 0.0  ;;  %v1917_v39 = vpop.f32.mrb[18].mxu1 }
 0x1b6   :  { %v603_v41 = vadd.f32 %v1917_v39, %v2418_v34  ;;  %v597_v42 = vpop.f32.mrb[19].mxu1 }
 0x1b7   :  { %v598_v43 = vadd.f32 %v597_v42, %v2418_v34  ;;  %1976 = vmatprep.mubr.msk.f32.mxu0 %vm424_vm1, %v746_v38 }
 0x1b8   :  { %1977 = vmatmul.mubr.msk.f32.vlgmr.msra.gmra.mrb[16].mxu0 %vm424_vm1, %v747_v40  ;;  %v749_v46 = vmax.f32 %v603_v41, 0.0 }
 0x1b9   :  { %v748_v44 = vmax.f32 %v598_v43, 0.0  ;;  %v1920_v45 = vpop.f32.mrb[20].mxu1 }
 0x1ba   :  { %v613_v47 = vadd.f32 %v1920_v45, %v2418_v34  ;;  %v607_v48 = vpop.f32.mrb[21].mxu1 }
 0x1bb   :  { %v608_v49 = vadd.f32 %v607_v48, %v2418_v34  ;;  %1979 = vmatprep.mubr.msk.f32.mxu0 %vm424_vm1, %v748_v44 }
 0x1bc   :  { %v751_v50 = vmax.f32 %v613_v47, 0.0  ;;  %1980 = vmatmul.mubr.msk.f32.gmra.mrb[18].mxu0 %vm424_vm1, %v749_v46 }
 0x1bd   :  { %v750_v51 = vmax.f32 %v608_v49, 0.0  ;;  %v1923_v52 = vpop.f32.mrb[22].mxu1 }
 0x1be   :  { %v623_v53 = vadd.f32 %v1923_v52, %v2418_v34  ;;  %v617_v54 = vpop.f32.mrb[23].mxu1 }
 0x1bf   :  { %v618_v55 = vadd.f32 %v617_v54, %v2418_v34  ;;  %1982 = vmatprep.mubr.msk.f32.mxu0 %vm424_vm1, %v750_v51 }
 0x1c0   :  { %v753_v56 = vmax.f32 %v623_v53, 0.0  ;;  %1983 = vmatmul.mubr.msk.f32.gmra.mrb[20].mxu0 %vm424_vm1, %v751_v50 }
 0x1c1   :  { %v752_v57 = vmax.f32 %v618_v55, 0.0  ;;  %v1926_v59 = vpop.f32.mrb[24].mxu1 }
 0x1c2   :  { %v633_v62 = vadd.f32 %v1926_v59, %v2418_v34  ;;  %v627_v63 = vpop.f32.mrb[25].mxu1 }
 0x1c3   :  { %v628_v0 = vadd.f32 %v627_v63, %v2418_v34  ;;  %1985 = vmatprep.mubr.msk.f32.mxu0 %vm424_vm1, %v752_v57 }
 0x1c4   :  { %v755_v1 = vmax.f32 %v633_v62, 0.0  ;;  %1986 = vmatmul.mubr.msk.f32.gmra.mrb[22].mxu0 %vm424_vm1, %v753_v56 }
 0x1c5   :  { %v754_v2 = vmax.f32 %v628_v0, 0.0  ;;  %v1929_v3 = vpop.f32.mrb[26].mxu1 }
 0x1c6   :  { %v643_v5 = vadd.f32 %v1929_v3, %v2418_v34  ;;  %v637_v6 = vpop.f32.mrb[27].mxu1 }
 0x1c7   :  { %v638_v7 = vadd.f32 %v637_v6, %v2418_v34  ;;  %1988 = vmatprep.mubr.msk.f32.mxu0 %vm424_vm1, %v754_v2 }
 0x1c8   :  { %v757_v8 = vmax.f32 %v643_v5, 0.0  ;;  %1989 = vmatmul.mubr.msk.f32.gmra.mrb[24].mxu0 %vm424_vm1, %v755_v1 }
 0x1c9   :  { %v756_v9 = vmax.f32 %v638_v7, 0.0  ;;  %v1932_v4 = vpop.f32.mrb[28].mxu1 }
 0x1ca   :  { %v653_v10 = vadd.f32 %v1932_v4, %v2418_v34  ;;  %v647_v11 = vpop.f32.mrb[29].mxu1 }
 0x1cb   :  { %v648_v13 = vadd.f32 %v647_v11, %v2418_v34  ;;  %1991 = vmatprep.mubr.msk.f32.mxu0 %vm424_vm1, %v756_v9  ;;  %v788_v9 = vsub.s32 2, %v2332_v58 }
 0x1cc   :  { %v759_v14 = vmax.f32 %v653_v10, 0.0  ;;  %1992 = vmatmul.mubr.msk.f32.gmra.mrb[26].mxu0 %vm424_vm1, %v757_v8 }
 0x1cd   :  { %v758_v12 = vmax.f32 %v648_v13, 0.0  ;;  %v1935_v15 = vpop.f32.mrb[30].mxu1  ;;  %v2486_v4 = vrot.slane %v2338_v60, %v788_v9 }
 0x1ce   :  { %v663_v16 = vadd.f32 %v1935_v15, %v2418_v34  ;;  %v657_v17 = vpop.f32.mrb[31].mxu1 }
 0x1cf   :  { %v658_v18 = vadd.f32 %v657_v17, %v2418_v34  ;;  %1994 = vmatprep.mubr.msk.f32.mxu0 %vm424_vm1, %v758_v12 }
 0x1d0   :  { %v761_v19 = vmax.f32 %v663_v16, 0.0  ;;  %1995 = vmatmul.mubr.msk.f32.gmra.mrb[28].mxu0 %vm424_vm1, %v759_v14 }
 0x1d1   :  { %v760_v20 = vmax.f32 %v658_v18, 0.0  ;;  %v1938_v21 = vpop.f32.mrb[32].mxu1 }
 0x1d2   :  { %v673_v22 = vadd.f32 %v1938_v21, %v2418_v34  ;;  %v667_v23 = vpop.f32.mrb[33].mxu1 }
 0x1d3   :  { %v668_v24 = vadd.f32 %v667_v23, %v2418_v34  ;;  %1997 = vmatprep.mubr.msk.f32.mxu0 %vm424_vm1, %v760_v20 }
 0x1d4   :  { %v763_v25 = vmax.f32 %v673_v22, 0.0  ;;  %1998 = vmatmul.mubr.msk.f32.gmra.mrb[30].mxu0 %vm424_vm1, %v761_v19 }
 0x1d5   :  { %v762_v26 = vmax.f32 %v668_v24, 0.0  ;;  %v1941_v27 = vpop.f32.mrb[34].mxu1 }
 0x1d6   :  { %v683_v28 = vadd.f32 %v1941_v27, %v2418_v34  ;;  %v677_v29 = vpop.f32.mrb[35].mxu1 }
 0x1d7   :  { %v678_v30 = vadd.f32 %v677_v29, %v2418_v34  ;;  %2000 = vmatprep.mubr.msk.f32.mxu0 %vm424_vm1, %v762_v26 }
 0x1d8   :  { %v765_v31 = vmax.f32 %v683_v28, 0.0  ;;  %2001 = vmatmul.mubr.msk.f32.gmra.mrb[32].mxu0 %vm424_vm1, %v763_v25 }
 0x1d9   :  { %v764_v32 = vmax.f32 %v678_v30, 0.0  ;;  %v1944_v33 = vpop.f32.mrb[36].mxu1 }
 0x1da   :  { %v693_v35 = vadd.f32 %v1944_v33, %v2418_v34  ;;  %v687_v36 = vpop.f32.mrb[37].mxu1 }
 0x1db   :  { %v688_v37 = vadd.f32 %v687_v36, %v2418_v34  ;;  %2003 = vmatprep.mubr.msk.f32.mxu0 %vm424_vm1, %v764_v32 }
 0x1dc   :  { %v767_v61 = vmax.f32 %v693_v35, 0.0  ;;  %2004 = vmatmul.mubr.msk.f32.gmra.mrb[34].mxu0 %vm424_vm1, %v765_v31 }
 0x1dd   :  { %v766_v38 = vmax.f32 %v688_v37, 0.0  ;;  %v1947_v39 = vpop.f32.mrb[38].mxu1 }
 0x1de   :  { %v703_v40 = vadd.f32 %v1947_v39, %v2418_v34  ;;  %v697_v41 = vpop.f32.mrb[39].mxu1 }
 0x1df   :  { %v698_v42 = vadd.f32 %v697_v41, %v2418_v34  ;;  %2006 = vmatprep.mubr.msk.f32.mxu0 %vm424_vm1, %v766_v38 }
 0x1e0   :  { %v769_v43 = vmax.f32 %v703_v40, 0.0  ;;  %2007 = vmatmul.mubr.msk.f32.gmra.mrb[36].mxu0 %vm424_vm1, %v767_v61 }
 0x1e1   :  { %v768_v44 = vmax.f32 %v698_v42, 0.0  ;;  %v1950_v45 = vpop.f32.mrb[40].mxu1 }
 0x1e2   :  { %v713_v46 = vadd.f32 %v1950_v45, %v2418_v34  ;;  %v707_v47 = vpop.f32.mrb[41].mxu1 }
 0x1e3   :  { %v708_v48 = vadd.f32 %v707_v47, %v2418_v34  ;;  %2009 = vmatprep.mubr.msk.f32.mxu0 %vm424_vm1, %v768_v44 }
 0x1e4   :  { %v771_v49 = vmax.f32 %v713_v46, 0.0  ;;  %2010 = vmatmul.mubr.msk.f32.gmra.mrb[38].mxu0 %vm424_vm1, %v769_v43 }
 0x1e5   :  { %v770_v50 = vmax.f32 %v708_v48, 0.0  ;;  %v1953_v51 = vpop.f32.mrb[42].mxu1 }
 0x1e6   :  { %v723_v52 = vadd.f32 %v1953_v51, %v2418_v34  ;;  %v717_v53 = vpop.f32.mrb[43].mxu1 }
 0x1e7   :  { %v718_v54 = vadd.f32 %v717_v53, %v2418_v34  ;;  %2012 = vmatprep.mubr.msk.f32.mxu0 %vm424_vm1, %v770_v50 }
 0x1e8   :  { %v773_v55 = vmax.f32 %v723_v52, 0.0  ;;  %2013 = vmatmul.mubr.msk.f32.gmra.mrb[40].mxu0 %vm424_vm1, %v771_v49 }
 0x1e9   :  { %v772_v56 = vmax.f32 %v718_v54, 0.0  ;;  %v1956_v57 = vpop.f32.mrb[44].mxu1 }
 0x1ea   :  { %v733_v59 = vadd.f32 %v1956_v57, %v2418_v34  ;;  %v727_v62 = vpop.f32.mrb[45].mxu1 }
 0x1eb   :  { %v728_v63 = vadd.f32 %v727_v62, %v2418_v34  ;;  %2015 = vmatprep.mubr.msk.f32.mxu0 %vm424_vm1, %v772_v56 }
 0x1ec   :  { %v775_v0 = vmax.f32 %v733_v59, 0.0  ;;  %2016 = vmatmul.mubr.msk.f32.gmra.mrb[42].mxu0 %vm424_vm1, %v773_v55 }
 0x1ed   :  { %v774_v1 = vmax.f32 %v728_v63, 0.0  ;;  %v1959_v2 = vpop.f32.mrb[46].mxu1 }
 0x1ee   :  { %v743_v3 = vadd.f32 %v1959_v2, %v2418_v34  ;;  %v737_v5 = vpop.f32.mrb[47].mxu1 }
 0x1ef   :  { %v738_v6 = vadd.f32 %v737_v5, %v2418_v34  ;;  %2018 = vmatprep.mubr.msk.f32.mxu0 %vm424_vm1, %v774_v1 }
 0x1f0   :  { %v777_v7 = vmax.f32 %v743_v3, 0.0  ;;  %2019 = vmatmul.mubr.msk.f32.gmra.mrb[44].mxu0 %vm424_vm1, %v775_v0 }
 0x1f1   :  { %v776_v8 = vmax.f32 %v738_v6, 0.0 }
 0x1f3   :  { %2021 = vmatprep.mubr.msk.f32.mxu0 %vm424_vm1, %v776_v8 }
 0x1f4   :  { %2022 = vmatmul.mubr.msk.f32.gmra.mrb[46].mxu0 %vm424_vm1, %v777_v7 }
 0x28b   :  { %v1978_v10 = vpop.f32.mrb[16].mxu0 }
 0x28c   :  { %v2489_v11 = vadd.f32 %v1978_v10, %v2486_v4  ;;  %v952_v34 = vpop.f32.mrb[17].mxu0 }
 0x28d   :  { %v2492_v13 = vadd.f32 %v952_v34, %v2486_v4 }
 0x28e   :  { %v1115_v14 = vsel %vm1111_vm2, %v2489_v11, 0.0 }
 0x28f   :  { %1116 = vadd.xlane.f32.xlu0 %v1115_v14  ;;  %v1981_v12 = vpop.f32.mrb[18].mxu0  ;;  %v1112_v18 = vsel %vm1111_vm2, %v2492_v13, 0.0 }
 0x290   :  { %v2497_v15 = vadd.f32 %v1981_v12, %v2486_v4  ;;  %v962_v16 = vpop.f32.mrb[19].mxu0 }
 0x291   :  { %v2500_v60 = vadd.f32 %v962_v16, %v2486_v4 }
 0x292   :  { %v1121_v17 = vsel %vm1111_vm2, %v2497_v15, 0.0 }
 0x293   :  { %1122 = vadd.xlane.f32.xlu1 %v1121_v17  ;;  %v1984_v19 = vpop.f32.mrb[20].mxu0  ;;  %1113 = vadd.xlane.f32.xlu0 %v1112_v18  ;;  %v1118_v23 = vsel %vm1111_vm2, %v2500_v60, 0.0 }
 0x294   :  { %v972_v20 = vpop.f32.mrb[21].mxu0  ;;  %v2510_v22 = vadd.f32 %v1984_v19, %v2486_v4 }
 0x295   :  { %v2507_v21 = vadd.f32 %v972_v20, %v2486_v4 }
 0x296   :  { %v1127_v29 = vsel %vm1111_vm2, %v2510_v22, 0.0 }
 0x297   :  { %v1987_v24 = vpop.f32.mrb[22].mxu0  ;;  %1119 = vadd.xlane.f32.xlu1 %v1118_v23  ;;  %v1124_v25 = vsel %vm1111_vm2, %v2507_v21, 0.0 }
 0x298   :  { %v982_v26 = vpop.f32.mrb[23].mxu0  ;;  %1125 = vadd.xlane.f32.xlu0 %v1124_v25  ;;  %v2520_v28 = vadd.f32 %v1987_v24, %v2486_v4 }
 0x299   :  { %v2517_v27 = vadd.f32 %v982_v26, %v2486_v4 }
 0x29a   :  { %v1133_v36 = vsel %vm1111_vm2, %v2520_v28, 0.0 }
 0x29b   :  { %v1990_v30 = vpop.f32.mrb[24].mxu0  ;;  %1128 = vadd.xlane.f32.xlu1 %v1127_v29  ;;  %v1130_v31 = vsel %vm1111_vm2, %v2517_v27, 0.0 }
 0x29c   :  { %v992_v32 = vpop.f32.mrb[25].mxu0  ;;  %1131 = vadd.xlane.f32.xlu0 %v1130_v31  ;;  %v2530_v35 = vadd.f32 %v1990_v30, %v2486_v4 }
 0x29d   :  { %v2527_v33 = vadd.f32 %v992_v32, %v2486_v4 }
 0x29e   :  { %v1139_v41 = vsel %vm1111_vm2, %v2530_v35, 0.0 }
 0x29f   :  { %v1993_v37 = vpop.f32.mrb[26].mxu0  ;;  %1134 = vadd.xlane.f32.xlu1 %v1133_v36  ;;  %v1136_v61 = vsel %vm1111_vm2, %v2527_v33, 0.0 }
 0x2a0   :  { %v1002_v38 = vpop.f32.mrb[27].mxu0  ;;  %1137 = vadd.xlane.f32.xlu0 %v1136_v61  ;;  %v2540_v40 = vadd.f32 %v1993_v37, %v2486_v4 }
 0x2a1   :  { %v2537_v39 = vadd.f32 %v1002_v38, %v2486_v4 }
 0x2a2   :  { %v1145_v47 = vsel %vm1111_vm2, %v2540_v40, 0.0 }
 0x2a3   :  { %v1996_v42 = vpop.f32.mrb[28].mxu0  ;;  %1140 = vadd.xlane.f32.xlu1 %v1139_v41  ;;  %v1142_v43 = vsel %vm1111_vm2, %v2537_v39, 0.0 }
 0x2a4   :  { %v1012_v44 = vpop.f32.mrb[29].mxu0  ;;  %1143 = vadd.xlane.f32.xlu0 %v1142_v43  ;;  %v2550_v46 = vadd.f32 %v1996_v42, %v2486_v4 }
 0x2a5   :  { %v2547_v45 = vadd.f32 %v1012_v44, %v2486_v4 }
 0x2a6   :  { %v1151_v53 = vsel %vm1111_vm2, %v2550_v46, 0.0 }
 0x2a7   :  { %v1999_v48 = vpop.f32.mrb[30].mxu0  ;;  %1146 = vadd.xlane.f32.xlu1 %v1145_v47  ;;  %v1148_v49 = vsel %vm1111_vm2, %v2547_v45, 0.0 }
 0x2a8   :  { %v1022_v50 = vpop.f32.mrb[31].mxu0  ;;  %1149 = vadd.xlane.f32.xlu0 %v1148_v49  ;;  %v2560_v52 = vadd.f32 %v1999_v48, %v2486_v4 }
 0x2a9   :  { %v2557_v51 = vadd.f32 %v1022_v50, %v2486_v4 }
 0x2aa   :  { %v1157_v62 = vsel %vm1111_vm2, %v2560_v52, 0.0 }
 0x2ab   :  { %v2002_v54 = vpop.f32.mrb[32].mxu0  ;;  %1152 = vadd.xlane.f32.xlu1 %v1151_v53  ;;  %v1154_v55 = vsel %vm1111_vm2, %v2557_v51, 0.0 }
 0x2ac   :  { %v1032_v56 = vpop.f32.mrb[33].mxu0  ;;  %1155 = vadd.xlane.f32.xlu0 %v1154_v55  ;;  %v2570_v59 = vadd.f32 %v2002_v54, %v2486_v4 }
 0x2ad   :  { %v2567_v57 = vadd.f32 %v1032_v56, %v2486_v4 }
 0x2ae   :  { %v1163_v5 = vsel %vm1111_vm2, %v2570_v59, 0.0 }
 0x2af   :  { %v2005_v63 = vpop.f32.mrb[34].mxu0  ;;  %1158 = vadd.xlane.f32.xlu1 %v1157_v62  ;;  %v1160_v0 = vsel %vm1111_vm2, %v2567_v57, 0.0 }
 0x2b0   :  { %v1042_v1 = vpop.f32.mrb[35].mxu0  ;;  %1161 = vadd.xlane.f32.xlu0 %v1160_v0  ;;  %v2580_v3 = vadd.f32 %v2005_v63, %v2486_v4 }
 0x2b1   :  { %v2577_v2 = vadd.f32 %v1042_v1, %v2486_v4 }
 0x2b2   :  { %v1169_v34 = vsel %vm1111_vm2, %v2580_v3, 0.0 }
 0x2b3   :  { %v2008_v6 = vpop.f32.mrb[36].mxu0  ;;  %1164 = vadd.xlane.f32.xlu1 %v1163_v5  ;;  %v1166_v7 = vsel %vm1111_vm2, %v2577_v2, 0.0 }
 0x2b4   :  { %v1052_v8 = vpop.f32.mrb[37].mxu0  ;;  %1167 = vadd.xlane.f32.xlu0 %v1166_v7  ;;  %v2590_v10 = vadd.f32 %v2008_v6, %v2486_v4 }
 0x2b5   :  { %v2587_v9 = vadd.f32 %v1052_v8, %v2486_v4 }
 0x2b6   :  { %v1175_v19 = vsel %vm1111_vm2, %v2590_v10, 0.0 }
 0x2b7   :  { %v2011_v14 = vpop.f32.mrb[38].mxu0  ;;  %1170 = vadd.xlane.f32.xlu1 %v1169_v34  ;;  %v1172_v12 = vsel %vm1111_vm2, %v2587_v9, 0.0 }
 0x2b8   :  { %v1062_v16 = vpop.f32.mrb[39].mxu0  ;;  %1173 = vadd.xlane.f32.xlu0 %v1172_v12  ;;  %v2600_v18 = vadd.f32 %v2011_v14, %v2486_v4 }
 0x2b9   :  { %v2597_v17 = vadd.f32 %v1062_v16, %v2486_v4 }
 0x2ba   :  { %v1181_v29 = vsel %vm1111_vm2, %v2600_v18, 0.0 }
 0x2bb   :  { %v2014_v20 = vpop.f32.mrb[40].mxu0  ;;  %1176 = vadd.xlane.f32.xlu1 %v1175_v19  ;;  %v1178_v23 = vsel %vm1111_vm2, %v2597_v17, 0.0 }
 0x2bc   :  { %v1072_v24 = vpop.f32.mrb[41].mxu0  ;;  %1179 = vadd.xlane.f32.xlu0 %v1178_v23  ;;  %v2610_v26 = vadd.f32 %v2014_v20, %v2486_v4 }
 0x2bd   :  { %v2607_v25 = vadd.f32 %v1072_v24, %v2486_v4 }
 0x2be   :  { %v1187_v61 = vsel %vm1111_vm2, %v2610_v26, 0.0 }
 0x2bf   :  { %v2017_v30 = vpop.f32.mrb[42].mxu0  ;;  %1182 = vadd.xlane.f32.xlu1 %v1181_v29  ;;  %v1184_v31 = vsel %vm1111_vm2, %v2607_v25, 0.0 }
 0x2c0   :  { %v1082_v32 = vpop.f32.mrb[43].mxu0  ;;  %1185 = vadd.xlane.f32.xlu0 %v1184_v31  ;;  %v2620_v37 = vadd.f32 %v2017_v30, %v2486_v4 }
 0x2c1   :  { %v2617_v36 = vadd.f32 %v1082_v32, %v2486_v4 }
 0x2c2   :  { %v1193_v47 = vsel %vm1111_vm2, %v2620_v37, 0.0 }
 0x2c3   :  { %v2020_v38 = vpop.f32.mrb[44].mxu0  ;;  %1188 = vadd.xlane.f32.xlu1 %v1187_v61  ;;  %v1190_v41 = vsel %vm1111_vm2, %v2617_v36, 0.0 }
 0x2c4   :  { %v1092_v42 = vpop.f32.mrb[45].mxu0  ;;  %1191 = vadd.xlane.f32.xlu0 %v1190_v41  ;;  %v2630_v44 = vadd.f32 %v2020_v38, %v2486_v4 }
 0x2c5   :  { %v2627_v43 = vadd.f32 %v1092_v42, %v2486_v4 }
 0x2c6   :  { %v1199_v55 = vsel %vm1111_vm2, %v2630_v44, 0.0 }
 0x2c7   :  { %v2023_v48 = vpop.f32.mrb[46].mxu0  ;;  %1194 = vadd.xlane.f32.xlu1 %v1193_v47  ;;  %v1196_v49 = vsel %vm1111_vm2, %v2627_v43, 0.0 }
 0x2c8   :  { %v2637_v50 = vadd.f32 %v2023_v48, %v2486_v4  ;;  %v1102_v53 = vpop.f32.mrb[47].mxu0  ;;  %1197 = vadd.xlane.f32.xlu0 %v1196_v49 }
 0x2c9   :  { %v2640_v54 = vadd.f32 %v1102_v53, %v2486_v4 }
 0x2ca   :  { %v1205_v62 = vsel %vm1111_vm2, %v2637_v50, 0.0 }
 0x2cb   :  { %1200 = vadd.xlane.f32.xlu1 %v1199_v55  ;;  %v1202_v56 = vsel %vm1111_vm2, %v2640_v54, 0.0 }
 0x2cc   :  { %1203 = vadd.xlane.f32.xlu0 %v1202_v56 }
 0x2cf   :  { %1206 = vadd.xlane.f32.xlu1 %v1205_v62 }
 0x31c   :  { %v1117_v63 = vpop.xlane.xlu0 %1116 }
 0x31d   :  { %v1210_v0 = vmul.f32 0.03125, %v1117_v63 }
 0x31f   :  { %v2649_v1 = vsub.f32 %v2489_v11, %v1210_v0 }
 0x320   :  { %v1123_v5 = vpop.xlane.xlu1 %1122  ;;  %v1114_v4 = vpop.xlane.xlu0 %1113 }
 0x321   :  { %v1212_v6 = vmul.f32 0.03125, %v1123_v5  ;;  %v1209_v7 = vmul.f32 0.03125, %v1114_v4  ;;  %v1274_v8 = vmul.f32 %v2649_v1, %v2649_v1 }
 0x323   :  { %v2654_v34 = vsub.f32 %v2497_v15, %v1212_v6  ;;  %v2657_v14 = vsub.f32 %v2492_v13, %v1209_v7  ;;  %v1308_v12 = vsel %vm1111_vm2, %v1274_v8, 0.0 }
 0x324   :  { %1309 = vadd.xlane.f32.xlu1 %v1308_v12  ;;  %v1120_v16 = vpop.xlane.xlu1 %1119 }
 0x325   :  { %v1211_v19 = vmul.f32 0.03125, %v1120_v16  ;;  %v1126_v11 = vpop.xlane.xlu0 %1125  ;;  %v1276_v20 = vmul.f32 %v2654_v34, %v2654_v34  ;;  %v1273_v23 = vmul.f32 %v2657_v14, %v2657_v14 }
 0x326   :  { %v1213_v24 = vmul.f32 0.03125, %v1126_v11 }
 0x327   :  { %v2665_v29 = vsub.f32 %v2500_v60, %v1211_v19  ;;  %v1314_v15 = vsel %vm1111_vm2, %v1276_v20, 0.0  ;;  %v1305_v13 = vsel %vm1111_vm2, %v1273_v23, 0.0 }
 0x328   :  { %v2670_v30 = vsub.f32 %v2507_v21, %v1213_v24  ;;  %1315 = vadd.xlane.f32.xlu1 %v1314_v15  ;;  %v1129_v31 = vpop.xlane.xlu1 %1128  ;;  %1306 = vadd.xlane.f32.xlu0 %v1305_v13 }
 0x329   :  { %v1214_v32 = vmul.f32 0.03125, %v1129_v31  ;;  %v1132_v61 = vpop.xlane.xlu0 %1131  ;;  %v1275_v38 = vmul.f32 %v2665_v29, %v2665_v29 }
 0x32a   :  { %v1215_v41 = vmul.f32 0.03125, %v1132_v61  ;;  %v1277_v47 = vmul.f32 %v2670_v30, %v2670_v30 }
 0x32b   :  { %v2675_v42 = vsub.f32 %v2510_v22, %v1214_v32  ;;  %v1311_v60 = vsel %vm1111_vm2, %v1275_v38, 0.0 }
 0x32c   :  { %v2681_v21 = vsub.f32 %v2517_v27, %v1215_v41  ;;  %v1135_v48 = vpop.xlane.xlu1 %1134  ;;  %1312 = vadd.xlane.f32.xlu0 %v1311_v60  ;;  %v1317_v63 = vsel %vm1111_vm2, %v1277_v47, 0.0 }
 0x32d   :  { %v1216_v49 = vmul.f32 0.03125, %v1135_v48  ;;  %v1138_v53 = vpop.xlane.xlu0 %1137  ;;  %v1278_v55 = vmul.f32 %v2675_v42, %v2675_v42 }
 0x32e   :  { %v1217_v56 = vmul.f32 0.03125, %v1138_v53  ;;  %v1279_v0 = vmul.f32 %v2681_v21, %v2681_v21 }
 0x32f   :  { %v2686_v62 = vsub.f32 %v2520_v28, %v1216_v49  ;;  %v1320_v22 = vsel %vm1111_vm2, %v1278_v55, 0.0 }
 0x330   :  { %v2693_v27 = vsub.f32 %v2527_v33, %v1217_v56  ;;  %1321 = vadd.xlane.f32.xlu1 %v1320_v22  ;;  %v1141_v5 = vpop.xlane.xlu1 %1140  ;;  %1318 = vadd.xlane.f32.xlu0 %v1317_v63  ;;  %v1323_v16 = vsel %vm1111_vm2, %v1279_v0, 0.0 }
 0x331   :  { %v1218_v4 = vmul.f32 0.03125, %v1141_v5  ;;  %v1144_v6 = vpop.xlane.xlu0 %1143  ;;  %v1280_v7 = vmul.f32 %v2686_v62, %v2686_v62 }
 0x332   :  { %v1219_v28 = vmul.f32 0.03125, %v1144_v6  ;;  %v1281_v33 = vmul.f32 %v2693_v27, %v2693_v27 }
 0x333   :  { %v2698_v8 = vsub.f32 %v2530_v35, %v1218_v4  ;;  %v1326_v12 = vsel %vm1111_vm2, %v1280_v7, 0.0 }
 0x334   :  { %v2705_v19 = vsub.f32 %v2537_v39, %v1219_v28  ;;  %1327 = vadd.xlane.f32.xlu1 %v1326_v12  ;;  %v1147_v11 = vpop.xlane.xlu1 %1146  ;;  %1324 = vadd.xlane.f32.xlu0 %v1323_v16  ;;  %v1329_v31 = vsel %vm1111_vm2, %v1281_v33, 0.0 }
 0x335   :  { %v1220_v20 = vmul.f32 0.03125, %v1147_v11  ;;  %v1150_v23 = vpop.xlane.xlu0 %1149  ;;  %v1282_v24 = vmul.f32 %v2698_v8, %v2698_v8 }
 0x336   :  { %v1221_v35 = vmul.f32 0.03125, %v1150_v23  ;;  %v1283_v39 = vmul.f32 %v2705_v19, %v2705_v19 }
 0x337   :  { %v2710_v15 = vsub.f32 %v2540_v40, %v1220_v20  ;;  %v1332_v13 = vsel %vm1111_vm2, %v1282_v24, 0.0 }
 0x338   :  { %v2717_v32 = vsub.f32 %v2547_v45, %v1221_v35  ;;  %1333 = vadd.xlane.f32.xlu1 %v1332_v13  ;;  %v1153_v61 = vpop.xlane.xlu1 %1152  ;;  %1330 = vadd.xlane.f32.xlu0 %v1329_v31  ;;  %v1335_v49 = vsel %vm1111_vm2, %v1283_v39, 0.0 }
 0x339   :  { %v1222_v38 = vmul.f32 0.03125, %v1153_v61  ;;  %v1156_v41 = vpop.xlane.xlu0 %1155  ;;  %v1284_v60 = vmul.f32 %v2710_v15, %v2710_v15 }
 0x33a   :  { %v1223_v40 = vmul.f32 0.03125, %v1156_v41  ;;  %v1285_v45 = vmul.f32 %v2717_v32, %v2717_v32 }
 0x33b   :  { %v2722_v47 = vsub.f32 %v2550_v46, %v1222_v38  ;;  %v1338_v48 = vsel %vm1111_vm2, %v1284_v60, 0.0 }
 0x33c   :  { %v2729_v53 = vsub.f32 %v2557_v51, %v1223_v40  ;;  %1339 = vadd.xlane.f32.xlu1 %v1338_v48  ;;  %v1159_v55 = vpop.xlane.xlu1 %1158  ;;  %1336 = vadd.xlane.f32.xlu0 %v1335_v49  ;;  %v1341_v4 = vsel %vm1111_vm2, %v1285_v45, 0.0 }
 0x33d   :  { %v1224_v56 = vmul.f32 0.03125, %v1159_v55  ;;  %v1162_v22 = vpop.xlane.xlu0 %1161  ;;  %v1286_v63 = vmul.f32 %v2722_v47, %v2722_v47 }
 0x33e   :  { %v1225_v46 = vmul.f32 0.03125, %v1162_v22  ;;  %v1287_v51 = vmul.f32 %v2729_v53, %v2729_v53 }
 0x33f   :  { %v2734_v0 = vsub.f32 %v2560_v52, %v1224_v56  ;;  %v1344_v5 = vsel %vm1111_vm2, %v1286_v63, 0.0 }
 0x340   :  { %v2741_v6 = vsub.f32 %v2567_v57, %v1225_v46  ;;  %1345 = vadd.xlane.f32.xlu1 %v1344_v5  ;;  %v1165_v7 = vpop.xlane.xlu1 %1164  ;;  %1342 = vadd.xlane.f32.xlu0 %v1341_v4  ;;  %v1347_v20 = vsel %vm1111_vm2, %v1287_v51, 0.0 }
 0x341   :  { %v1226_v28 = vmul.f32 0.03125, %v1165_v7  ;;  %v1168_v12 = vpop.xlane.xlu0 %1167  ;;  %v1288_v16 = vmul.f32 %v2734_v0, %v2734_v0 }
 0x342   :  { %v1227_v52 = vmul.f32 0.03125, %v1168_v12  ;;  %v1289_v57 = vmul.f32 %v2741_v6, %v2741_v6 }
 0x343   :  { %v2746_v33 = vsub.f32 %v2570_v59, %v1226_v28  ;;  %v1350_v11 = vsel %vm1111_vm2, %v1288_v16, 0.0 }
 0x344   :  { %v2753_v23 = vsub.f32 %v2577_v2, %v1227_v52  ;;  %1351 = vadd.xlane.f32.xlu1 %v1350_v11  ;;  %v1171_v24 = vpop.xlane.xlu1 %1170  ;;  %1348 = vadd.xlane.f32.xlu0 %v1347_v20  ;;  %v1353_v38 = vsel %vm1111_vm2, %v1289_v57, 0.0 }
 0x345   :  { %v1228_v35 = vmul.f32 0.03125, %v1171_v24  ;;  %v1174_v13 = vpop.xlane.xlu0 %1173  ;;  %v1290_v31 = vmul.f32 %v2746_v33, %v2746_v33 }
 0x346   :  { %v1229_v59 = vmul.f32 0.03125, %v1174_v13  ;;  %v1291_v2 = vmul.f32 %v2753_v23, %v2753_v23 }
 0x347   :  { %v2758_v39 = vsub.f32 %v2580_v3, %v1228_v35  ;;  %v1356_v61 = vsel %vm1111_vm2, %v1290_v31, 0.0 }
 0x348   :  { %v2765_v41 = vsub.f32 %v2587_v9, %v1229_v59  ;;  %1357 = vadd.xlane.f32.xlu1 %v1356_v61  ;;  %v1177_v60 = vpop.xlane.xlu1 %1176  ;;  %1354 = vadd.xlane.f32.xlu0 %v1353_v38  ;;  %v1359_v56 = vsel %vm1111_vm2, %v1291_v2, 0.0 }
 0x349   :  { %v1230_v40 = vmul.f32 0.03125, %v1177_v60  ;;  %v1180_v48 = vpop.xlane.xlu0 %1179  ;;  %v1292_v49 = vmul.f32 %v2758_v39, %v2758_v39 }
 0x34a   :  { %v1231_v3 = vmul.f32 0.03125, %v1180_v48  ;;  %v1293_v9 = vmul.f32 %v2765_v41, %v2765_v41 }
 0x34b   :  { %v2770_v45 = vsub.f32 %v2590_v10, %v1230_v40  ;;  %v1362_v55 = vsel %vm1111_vm2, %v1292_v49, 0.0 }
 0x34c   :  { %v2777_v22 = vsub.f32 %v2597_v17, %v1231_v3  ;;  %1363 = vadd.xlane.f32.xlu1 %v1362_v55  ;;  %v1183_v63 = vpop.xlane.xlu1 %1182  ;;  %1360 = vadd.xlane.f32.xlu0 %v1359_v56  ;;  %v1365_v28 = vsel %vm1111_vm2, %v1293_v9, 0.0 }
 0x34d   :  { %v1232_v46 = vmul.f32 0.03125, %v1183_v63  ;;  %v1186_v5 = vpop.xlane.xlu0 %1185  ;;  %v1294_v4 = vmul.f32 %v2770_v45, %v2770_v45 }
 0x34e   :  { %v1233_v10 = vmul.f32 0.03125, %v1186_v5  ;;  %v1295_v17 = vmul.f32 %v2777_v22, %v2777_v22 }
 0x34f   :  { %v2782_v51 = vsub.f32 %v2600_v18, %v1232_v46  ;;  %v1368_v7 = vsel %vm1111_vm2, %v1294_v4, 0.0 }
 0x350   :  { %v2789_v12 = vsub.f32 %v2607_v25, %v1233_v10  ;;  %1369 = vadd.xlane.f32.xlu1 %v1368_v7  ;;  %v1189_v16 = vpop.xlane.xlu1 %1188  ;;  %1366 = vadd.xlane.f32.xlu0 %v1365_v28  ;;  %v1371_v35 = vsel %vm1111_vm2, %v1295_v17, 0.0 }
 0x351   :  { %v1234_v52 = vmul.f32 0.03125, %v1189_v16  ;;  %v1192_v11 = vpop.xlane.xlu0 %1191  ;;  %v1296_v20 = vmul.f32 %v2782_v51, %v2782_v51 }
 0x352   :  { %v1235_v18 = vmul.f32 0.03125, %v1192_v11  ;;  %v1297_v25 = vmul.f32 %v2789_v12, %v2789_v12 }
 0x353   :  { %v2794_v57 = vsub.f32 %v2610_v26, %v1234_v52  ;;  %v1374_v24 = vsel %vm1111_vm2, %v1296_v20, 0.0 }
 0x354   :  { %v2801_v13 = vsub.f32 %v2617_v36, %v1235_v18  ;;  %1375 = vadd.xlane.f32.xlu1 %v1374_v24  ;;  %v1195_v31 = vpop.xlane.xlu1 %1194  ;;  %1372 = vadd.xlane.f32.xlu0 %v1371_v35  ;;  %v1377_v40 = vsel %vm1111_vm2, %v1297_v25, 0.0 }
 0x355   :  { %v1236_v59 = vmul.f32 0.03125, %v1195_v31  ;;  %v1198_v61 = vpop.xlane.xlu0 %1197  ;;  %v1298_v38 = vmul.f32 %v2794_v57, %v2794_v57 }
 0x356   :  { %v1237_v26 = vmul.f32 0.03125, %v1198_v61  ;;  %v1299_v36 = vmul.f32 %v2801_v13, %v2801_v13 }
 0x357   :  { %v2806_v2 = vsub.f32 %v2620_v37, %v1236_v59  ;;  %v1380_v60 = vsel %vm1111_vm2, %v1298_v38, 0.0 }
 0x358   :  { %v2813_v48 = vsub.f32 %v2627_v43, %v1237_v26  ;;  %1381 = vadd.xlane.f32.xlu1 %v1380_v60  ;;  %v1201_v49 = vpop.xlane.xlu1 %1200  ;;  %1378 = vadd.xlane.f32.xlu0 %v1377_v40  ;;  %v1383_v46 = vsel %vm1111_vm2, %v1299_v36, 0.0  ;;  %v1531_v60 = vsub.s32 3, %v2332_v58  ;;  %v1567_v36 = vsub.s32 4, %v2332_v58 }
 0x359   :  { %v1238_v3 = vmul.f32 0.03125, %v1201_v49  ;;  %v1204_v55 = vpop.xlane.xlu0 %1203  ;;  %v1300_v56 = vmul.f32 %v2806_v2, %v2806_v2 }
 0x35a   :  { %v1239_v37 = vmul.f32 0.03125, %v1204_v55  ;;  %v1301_v43 = vmul.f32 %v2813_v48, %v2813_v48 }
 0x35b   :  { %v2818_v9 = vsub.f32 %v2630_v44, %v1238_v3  ;;  %v1386_v63 = vsel %vm1111_vm2, %v1300_v56, 0.0 }
 0x35c   :  { %v2825_v5 = vsub.f32 %v2640_v54, %v1239_v37  ;;  %1387 = vadd.xlane.f32.xlu1 %v1386_v63  ;;  %v1207_v4 = vpop.xlane.xlu1 %1206  ;;  %1384 = vadd.xlane.f32.xlu0 %v1383_v46  ;;  %v1389_v17 = vsel %vm1111_vm2, %v1301_v43, 0.0  ;;  %v2122_v37 = vld [vmem:[%s3077_s4] sm:$0x1f] }
 0x35d   :  { %v1240_v10 = vmul.f32 0.03125, %v1207_v4  ;;  %v1302_v7 = vmul.f32 %v2818_v9, %v2818_v9  ;;  %v2845_v63 = vrot.slane %v2122_v37, %v1531_v60 }
 0x35e   :  { %v1303_v16 = vmul.f32 %v2825_v5, %v2825_v5 }
 0x35f   :  { %v2830_v44 = vsub.f32 %v2637_v50, %v1240_v10  ;;  %v1392_v28 = vsel %vm1111_vm2, %v1302_v7, 0.0  ;;  %v2847_v10 = vrot.slane %v2122_v37, %v1567_v36 }
 0x360   :  { %1393 = vadd.xlane.f32.xlu1 %v1392_v28  ;;  %1390 = vadd.xlane.f32.xlu0 %v1389_v17  ;;  %v1395_v11 = vsel %vm1111_vm2, %v1303_v16, 0.0 }
 0x361   :  { %v1304_v54 = vmul.f32 %v2830_v44, %v2830_v44 }
 0x363   :  { %v1398_v52 = vsel %vm1111_vm2, %v1304_v54, 0.0 }
 0x364   :  { %1399 = vadd.xlane.f32.xlu1 %v1398_v52  ;;  %1396 = vadd.xlane.f32.xlu0 %v1395_v11 }
 0x3b1   :  { %v1310_v50 = vpop.xlane.xlu1 %1309 }
 0x3b2   :  { %v1402_v20 = vmul.f32 0.03125, %v1310_v50 }
 0x3b4   :  { %v1434_v18 = vadd.f32 1e-05, %v1402_v20 }
 0x3b5   :  { %v1316_v24 = vpop.xlane.xlu1 %1315  ;;  %v1307_v35 = vpop.xlane.xlu0 %1306 }
 0x3b6   :  { %2058 = vrsqrt.f32 %v1434_v18  ;;  %v1404_v25 = vmul.f32 0.03125, %v1316_v24  ;;  %v1401_v31 = vmul.f32 0.03125, %v1307_v35 }
 0x3b8   :  { %v1436_v59 = vadd.f32 1e-05, %v1404_v25  ;;  %v1433_v61 = vadd.f32 1e-05, %v1401_v31 }
 0x3b9   :  { %v1313_v38 = vpop.xlane.xlu0 %1312 }
 0x3ba   :  { %2060 = vrsqrt.f32 %v1436_v59  ;;  %v1403_v26 = vmul.f32 0.03125, %v1313_v38 }
 0x3bb   :  { %2062 = vrsqrt.f32 %v1433_v61 }
 0x3bc   :  { %v1435_v40 = vadd.f32 1e-05, %v1403_v26 }
 0x3bd   :  { %v1322_v49 = vpop.xlane.xlu1 %1321  ;;  %v1319_v3 = vpop.xlane.xlu0 %1318 }
 0x3be   :  { %2064 = vrsqrt.f32 %v1435_v40  ;;  %v1406_v55 = vmul.f32 0.03125, %v1322_v49  ;;  %v1405_v56 = vmul.f32 0.03125, %v1319_v3 }
 0x3c0   :  { %v2059_v46 = vpop.eup %2058  ;;  %v1438_v43 = vadd.f32 1e-05, %v1406_v55  ;;  %v1437_v4 = vadd.f32 1e-05, %v1405_v56 }
 0x3c1   :  { %v1498_v7 = vmul.f32 %v2059_v46, %v2649_v1  ;;  %v1328_v28 = vpop.xlane.xlu1 %1327  ;;  %v1325_v58 = vpop.xlane.xlu0 %1324 }
 0x3c2   :  { %2066 = vrsqrt.f32 %v1438_v43  ;;  %v1408_v17 = vmul.f32 0.03125, %v1328_v28  ;;  %v1407_v16 = vmul.f32 0.03125, %v1325_v58 }
 0x3c3   :  { %v1534_v54 = vmul.f32 %v2845_v63, %v1498_v7  ;;  %2068 = vrsqrt.f32 %v1437_v4 }
 0x3c4   :  { %v2061_v52 = vpop.eup %2060  ;;  %v1440_v11 = vadd.f32 1e-05, %v1408_v17  ;;  %v1439_v50 = vadd.f32 1e-05, %v1407_v16 }
 0x3c5   :  { %v2063_v20 = vpop.eup %2062  ;;  %v1570_v18 = vadd.f32 %v2847_v10, %v1534_v54  ;;  %v1500_v24 = vmul.f32 %v2061_v52, %v2654_v34  ;;  %v1334_v35 = vpop.xlane.xlu1 %1333 }
 0x3c6   :  { %v1331_v25 = vpop.xlane.xlu0 %1330  ;;  %v1497_v1 = vmul.f32 %v2063_v20, %v2657_v14  ;;  %2070 = vrsqrt.f32 %v1440_v11  ;;  %v1410_v31 = vmul.f32 0.03125, %v1334_v35 }
 0x3c7   :  { %v1409_v59 = vmul.f32 0.03125, %v1331_v25  ;;  %1602 = vst.msk [vmem:[%s3078_s5 + $0x8] sm:$0xff] %vm1111_vm2, %v1570_v18  ;;  %v1536_v61 = vmul.f32 %v2845_v63, %v1500_v24  ;;  %2072 = vrsqrt.f32 %v1439_v50 }
 0x3c8   :  { %v2065_v38 = vpop.eup %2064  ;;  %v1533_v26 = vmul.f32 %v2845_v63, %v1497_v1  ;;  %v1442_v60 = vadd.f32 1e-05, %v1410_v31 }
 0x3c9   :  { %v1441_v34 = vadd.f32 1e-05, %v1409_v59  ;;  %v1572_v40 = vadd.f32 %v2847_v10, %v1536_v61  ;;  %v1499_v14 = vmul.f32 %v2065_v38, %v2665_v29  ;;  %v1340_v36 = vpop.xlane.xlu1 %1339 }
 0x3ca   :  { %v1337_v49 = vpop.xlane.xlu0 %1336  ;;  %v1569_v3 = vadd.f32 %v2847_v10, %v1533_v26  ;;  %2074 = vrsqrt.f32 %v1442_v60  ;;  %v1412_v55 = vmul.f32 0.03125, %v1340_v36 }
 0x3cb   :  { %v1411_v56 = vmul.f32 0.03125, %v1337_v49  ;;  %1604 = vst.msk [vmem:[%s3078_s5 + $0x18] sm:$0xff] %vm1111_vm2, %v1572_v40  ;;  %v1535_v37 = vmul.f32 %v2845_v63, %v1499_v14  ;;  %2076 = vrsqrt.f32 %v1441_v34 }
 0x3cc   :  { %v2067_v46 = vpop.eup %2066  ;;  %1601 = vst.msk [vmem:[%s3078_s5] sm:$0xff] %vm1111_vm2, %v1569_v3  ;;  %v1444_v29 = vadd.f32 1e-05, %v1412_v55 }
 0x3cd   :  { %v1443_v43 = vadd.f32 1e-05, %v1411_v56  ;;  %v2069_v4 = vpop.eup %2068  ;;  %v1571_v7 = vadd.f32 %v2847_v10, %v1535_v37  ;;  %v1502_v28 = vmul.f32 %v2067_v46, %v2675_v42  ;;  %v1346_v58 = vpop.xlane.xlu1 %1345 }
 0x3ce   :  { %v1343_v17 = vpop.xlane.xlu0 %1342  ;;  %v1501_v16 = vmul.f32 %v2069_v4, %v2670_v30  ;;  %2078 = vrsqrt.f32 %v1444_v29  ;;  %v1414_v54 = vmul.f32 0.03125, %v1346_v58 }
 0x3cf   :  { %v1413_v52 = vmul.f32 0.03125, %v1343_v17  ;;  %1603 = vst.msk [vmem:[%s3078_s5 + $0x10] sm:$0xff] %vm1111_vm2, %v1571_v7  ;;  %v1538_v11 = vmul.f32 %v2845_v63, %v1502_v28  ;;  %2080 = vrsqrt.f32 %v1443_v43 }
 0x3d0   :  { %v2071_v50 = vpop.eup %2070  ;;  %v1537_v20 = vmul.f32 %v2845_v63, %v1501_v16  ;;  %v1446_v18 = vadd.f32 1e-05, %v1414_v54 }
 0x3d1   :  { %v1445_v42 = vadd.f32 1e-05, %v1413_v52  ;;  %v2073_v24 = vpop.eup %2072  ;;  %v1574_v35 = vadd.f32 %v2847_v10, %v1538_v11  ;;  %v1504_v30 = vmul.f32 %v2071_v50, %v2686_v62  ;;  %v1352_v25 = vpop.xlane.xlu1 %1351 }
 0x3d2   :  { %v1349_v1 = vpop.xlane.xlu0 %1348  ;;  %v1573_v31 = vadd.f32 %v2847_v10, %v1537_v20  ;;  %v1503_v59 = vmul.f32 %v2073_v24, %v2681_v21  ;;  %2082 = vrsqrt.f32 %v1446_v18  ;;  %v1416_v61 = vmul.f32 0.03125, %v1352_v25 }
 0x3d3   :  { %1606 = vst.msk [vmem:[%s3078_s5 + $0x28] sm:$0xff] %vm1111_vm2, %v1574_v35  ;;  %v1540_v38 = vmul.f32 %v2845_v63, %v1504_v30  ;;  %2084 = vrsqrt.f32 %v1445_v42  ;;  %v1415_v26 = vmul.f32 0.03125, %v1349_v1 }
 0x3d4   :  { %v2075_v60 = vpop.eup %2074  ;;  %1605 = vst.msk [vmem:[%s3078_s5 + $0x20] sm:$0xff] %vm1111_vm2, %v1573_v31  ;;  %v1539_v62 = vmul.f32 %v2845_v63, %v1503_v59  ;;  %v1448_v21 = vadd.f32 1e-05, %v1416_v61 }
 0x3d5   :  { %v2077_v34 = vpop.eup %2076  ;;  %v1576_v40 = vadd.f32 %v2847_v10, %v1540_v38  ;;  %v1506_v14 = vmul.f32 %v2075_v60, %v2698_v8  ;;  %v1447_v36 = vadd.f32 1e-05, %v1415_v26  ;;  %v1358_v49 = vpop.xlane.xlu1 %1357 }
 0x3d6   :  { %v1355_v3 = vpop.xlane.xlu0 %1354  ;;  %v1575_v55 = vadd.f32 %v2847_v10, %v1539_v62  ;;  %v1505_v56 = vmul.f32 %v2077_v34, %v2693_v27  ;;  %2086 = vrsqrt.f32 %v1448_v21  ;;  %v1418_v37 = vmul.f32 0.03125, %v1358_v49 }
 0x3d7   :  { %1608 = vst.msk [vmem:[%s3078_s5 + $0x38] sm:$0xff] %vm1111_vm2, %v1576_v40  ;;  %v1542_v46 = vmul.f32 %v2845_v63, %v1506_v14  ;;  %2088 = vrsqrt.f32 %v1447_v36  ;;  %v1417_v29 = vmul.f32 0.03125, %v1355_v3 }
 0x3d8   :  { %v2079_v43 = vpop.eup %2078  ;;  %1607 = vst.msk [vmem:[%s3078_s5 + $0x30] sm:$0xff] %vm1111_vm2, %v1575_v55  ;;  %v1541_v8 = vmul.f32 %v2845_v63, %v1505_v56  ;;  %v1450_v27 = vadd.f32 1e-05, %v1418_v37 }
 0x3d9   :  { %v2081_v4 = vpop.eup %2080  ;;  %v1578_v7 = vadd.f32 %v2847_v10, %v1542_v46  ;;  %v1508_v28 = vmul.f32 %v2079_v43, %v2710_v15  ;;  %v1449_v58 = vadd.f32 1e-05, %v1417_v29  ;;  %v1364_v17 = vpop.xlane.xlu1 %1363 }
 0x3da   :  { %v1361_v16 = vpop.xlane.xlu0 %1360  ;;  %v1577_v54 = vadd.f32 %v2847_v10, %v1541_v8  ;;  %v1507_v52 = vmul.f32 %v2081_v4, %v2705_v19  ;;  %2090 = vrsqrt.f32 %v1450_v27  ;;  %v1420_v11 = vmul.f32 0.03125, %v1364_v17 }
 0x3db   :  { %1610 = vst.msk [vmem:[%s3078_s5 + $0x48] sm:$0xff] %vm1111_vm2, %v1578_v7  ;;  %v1544_v50 = vmul.f32 %v2845_v63, %v1508_v28  ;;  %2092 = vrsqrt.f32 %v1449_v58  ;;  %v1419_v20 = vmul.f32 0.03125, %v1361_v16 }
 0x3dc   :  { %v2083_v18 = vpop.eup %2082  ;;  %1609 = vst.msk [vmem:[%s3078_s5 + $0x40] sm:$0xff] %vm1111_vm2, %v1577_v54  ;;  %v1543_v15 = vmul.f32 %v2845_v63, %v1507_v52  ;;  %v1452_v19 = vadd.f32 1e-05, %v1420_v11 }
 0x3dd   :  { %v2085_v42 = vpop.eup %2084  ;;  %v1580_v24 = vadd.f32 %v2847_v10, %v1544_v50  ;;  %v1510_v35 = vmul.f32 %v2083_v18, %v2722_v47  ;;  %v1451_v30 = vadd.f32 1e-05, %v1419_v20  ;;  %v1370_v25 = vpop.xlane.xlu1 %1369 }
 0x3de   :  { %v1367_v1 = vpop.xlane.xlu0 %1366  ;;  %v1579_v31 = vadd.f32 %v2847_v10, %v1543_v15  ;;  %v1509_v59 = vmul.f32 %v2085_v42, %v2717_v32  ;;  %2094 = vrsqrt.f32 %v1452_v19  ;;  %v1422_v61 = vmul.f32 0.03125, %v1370_v25 }
 0x3df   :  { %1612 = vst.msk [vmem:[%s3078_s5 + $0x58] sm:$0xff] %vm1111_vm2, %v1580_v24  ;;  %v1546_v38 = vmul.f32 %v2845_v63, %v1510_v35  ;;  %2096 = vrsqrt.f32 %v1451_v30  ;;  %v1421_v26 = vmul.f32 0.03125, %v1367_v1 }
 0x3e0   :  { %v2087_v60 = vpop.eup %2086  ;;  %1611 = vst.msk [vmem:[%s3078_s5 + $0x50] sm:$0xff] %vm1111_vm2, %v1579_v31  ;;  %v1545_v47 = vmul.f32 %v2845_v63, %v1509_v59  ;;  %v1454_v32 = vadd.f32 1e-05, %v1422_v61 }
 0x3e1   :  { %v2089_v62 = vpop.eup %2088  ;;  %v1582_v21 = vadd.f32 %v2847_v10, %v1546_v38  ;;  %v1512_v34 = vmul.f32 %v2087_v60, %v2734_v0  ;;  %v1453_v40 = vadd.f32 1e-05, %v1421_v26  ;;  %v1376_v14 = vpop.xlane.xlu1 %1375 }
 0x3e2   :  { %v1373_v36 = vpop.xlane.xlu0 %1372  ;;  %v1581_v49 = vadd.f32 %v2847_v10, %v1545_v47  ;;  %v1511_v3 = vmul.f32 %v2089_v62, %v2729_v53  ;;  %2098 = vrsqrt.f32 %v1454_v32  ;;  %v1424_v55 = vmul.f32 0.03125, %v1376_v14 }
 0x3e3   :  { %1614 = vst.msk [vmem:[%s3078_s5 + $0x68] sm:$0xff] %vm1111_vm2, %v1582_v21  ;;  %v1548_v56 = vmul.f32 %v2845_v63, %v1512_v34  ;;  %2100 = vrsqrt.f32 %v1453_v40  ;;  %v1423_v37 = vmul.f32 0.03125, %v1373_v36 }
 0x3e4   :  { %v2091_v46 = vpop.eup %2090  ;;  %1613 = vst.msk [vmem:[%s3078_s5 + $0x60] sm:$0xff] %vm1111_vm2, %v1581_v49  ;;  %v1547_v0 = vmul.f32 %v2845_v63, %v1511_v3  ;;  %v1456_v53 = vadd.f32 1e-05, %v1424_v55 }
 0x3e5   :  { %v2093_v29 = vpop.eup %2092  ;;  %v1584_v43 = vadd.f32 %v2847_v10, %v1548_v56  ;;  %v1514_v8 = vmul.f32 %v2091_v46, %v2746_v33  ;;  %v1455_v27 = vadd.f32 1e-05, %v1423_v37  ;;  %v1382_v4 = vpop.xlane.xlu1 %1381 }
 0x3e6   :  { %v1379_v7 = vpop.xlane.xlu0 %1378  ;;  %v1583_v28 = vadd.f32 %v2847_v10, %v1547_v0  ;;  %v1513_v58 = vmul.f32 %v2093_v29, %v2741_v6  ;;  %2102 = vrsqrt.f32 %v1456_v53  ;;  %v1426_v17 = vmul.f32 0.03125, %v1382_v4 }
 0x3e7   :  { %1616 = vst.msk [vmem:[%s3078_s5 + $0x78] sm:$0xff] %vm1111_vm2, %v1584_v43  ;;  %v1550_v16 = vmul.f32 %v2845_v63, %v1514_v8  ;;  %2104 = vrsqrt.f32 %v1455_v27  ;;  %v1425_v54 = vmul.f32 0.03125, %v1379_v7 }
 0x3e8   :  { %v2095_v52 = vpop.eup %2094  ;;  %1615 = vst.msk [vmem:[%s3078_s5 + $0x70] sm:$0xff] %vm1111_vm2, %v1583_v28  ;;  %v1549_v33 = vmul.f32 %v2845_v63, %v1513_v58  ;;  %v1458_v6 = vadd.f32 1e-05, %v1426_v17 }
 0x3e9   :  { %v2097_v11 = vpop.eup %2096  ;;  %v1586_v50 = vadd.f32 %v2847_v10, %v1550_v16  ;;  %v1516_v20 = vmul.f32 %v2095_v52, %v2758_v39  ;;  %v1457_v18 = vadd.f32 1e-05, %v1425_v54  ;;  %v1388_v15 = vpop.xlane.xlu1 %1387 }
 0x3ea   :  { %v1385_v19 = vpop.xlane.xlu0 %1384  ;;  %v1585_v42 = vadd.f32 %v2847_v10, %v1549_v33  ;;  %v1515_v24 = vmul.f32 %v2097_v11, %v2753_v23  ;;  %2106 = vrsqrt.f32 %v1458_v6  ;;  %v1428_v35 = vmul.f32 0.03125, %v1388_v15 }
 0x3eb   :  { %1618 = vst.msk [vmem:[%s3078_s5 + $0x88] sm:$0xff] %vm1111_vm2, %v1586_v50  ;;  %v1552_v30 = vmul.f32 %v2845_v63, %v1516_v20  ;;  %2108 = vrsqrt.f32 %v1457_v18  ;;  %v1427_v25 = vmul.f32 0.03125, %v1385_v19 }
 0x3ec   :  { %v2099_v1 = vpop.eup %2098  ;;  %1617 = vst.msk [vmem:[%s3078_s5 + $0x80] sm:$0xff] %vm1111_vm2, %v1585_v42  ;;  %v1551_v39 = vmul.f32 %v2845_v63, %v1515_v24  ;;  %v1460_v23 = vadd.f32 1e-05, %v1428_v35 }
 0x3ed   :  { %v2101_v31 = vpop.eup %2100  ;;  %v1588_v59 = vadd.f32 %v2847_v10, %v1552_v30  ;;  %v1518_v61 = vmul.f32 %v2099_v1, %v2770_v45  ;;  %v1459_v38 = vadd.f32 1e-05, %v1427_v25  ;;  %v1394_v26 = vpop.xlane.xlu1 %1393 }
 0x3ee   :  { %v1391_v60 = vpop.xlane.xlu0 %1390  ;;  %v1587_v47 = vadd.f32 %v2847_v10, %v1551_v39  ;;  %v1517_v32 = vmul.f32 %v2101_v31, %v2765_v41  ;;  %2110 = vrsqrt.f32 %v1460_v23  ;;  %v1430_v62 = vmul.f32 0.03125, %v1394_v26 }
 0x3ef   :  { %1620 = vst.msk [vmem:[%s3078_s5 + $0x98] sm:$0xff] %vm1111_vm2, %v1588_v59  ;;  %v1554_v21 = vmul.f32 %v2845_v63, %v1518_v61  ;;  %2112 = vrsqrt.f32 %v1459_v38  ;;  %v1429_v34 = vmul.f32 0.03125, %v1391_v60 }
 0x3f0   :  { %v2103_v40 = vpop.eup %2102  ;;  %1619 = vst.msk [vmem:[%s3078_s5 + $0x90] sm:$0xff] %vm1111_vm2, %v1587_v47  ;;  %v1553_v45 = vmul.f32 %v2845_v63, %v1517_v32  ;;  %v1462_v41 = vadd.f32 1e-05, %v1430_v62 }
 0x3f1   :  { %v2105_v14 = vpop.eup %2104  ;;  %v1590_v36 = vadd.f32 %v2847_v10, %v1554_v21  ;;  %v1520_v49 = vmul.f32 %v2103_v40, %v2782_v51  ;;  %v1461_v3 = vadd.f32 1e-05, %v1429_v34  ;;  %v1400_v55 = vpop.xlane.xlu1 %1399 }
 0x3f2   :  { %v1397_v56 = vpop.xlane.xlu0 %1396  ;;  %v1589_v37 = vadd.f32 %v2847_v10, %v1553_v45  ;;  %v1519_v46 = vmul.f32 %v2105_v14, %v2777_v22  ;;  %2114 = vrsqrt.f32 %v1462_v41  ;;  %v1432_v0 = vmul.f32 0.03125, %v1400_v55 }
 0x3f3   :  { %1622 = vst.msk [vmem:[%s3078_s5 + $0xa8] sm:$0xff] %vm1111_vm2, %v1590_v36  ;;  %v1556_v53 = vmul.f32 %v2845_v63, %v1520_v49  ;;  %2116 = vrsqrt.f32 %v1461_v3  ;;  %v1431_v29 = vmul.f32 0.03125, %v1397_v56 }
 0x3f4   :  { %v2107_v43 = vpop.eup %2106  ;;  %1621 = vst.msk [vmem:[%s3078_s5 + $0xa0] sm:$0xff] %vm1111_vm2, %v1589_v37  ;;  %v1555_v51 = vmul.f32 %v2845_v63, %v1519_v46  ;;  %v1464_v22 = vadd.f32 1e-05, %v1432_v0 }
 0x3f5   :  { %v2109_v8 = vpop.eup %2108  ;;  %v1592_v27 = vadd.f32 %v2847_v10, %v1556_v53  ;;  %v1522_v4 = vmul.f32 %v2107_v43, %v2794_v57  ;;  %v1463_v7 = vadd.f32 1e-05, %v1431_v29 }
 0x3f6   :  { %v1591_v28 = vadd.f32 %v2847_v10, %v1555_v51  ;;  %v1521_v58 = vmul.f32 %v2109_v8, %v2789_v12  ;;  %2118 = vrsqrt.f32 %v1464_v22 }
 0x3f7   :  { %1624 = vst.msk [vmem:[%s3078_s5 + $0xb8] sm:$0xff] %vm1111_vm2, %v1592_v27  ;;  %v1558_v17 = vmul.f32 %v2845_v63, %v1522_v4  ;;  %2120 = vrsqrt.f32 %v1463_v7 }
 0x3f8   :  { %v2111_v16 = vpop.eup %2110  ;;  %1623 = vst.msk [vmem:[%s3078_s5 + $0xb0] sm:$0xff] %vm1111_vm2, %v1591_v28  ;;  %v1557_v57 = vmul.f32 %v2845_v63, %v1521_v58 }
 0x3f9   :  { %v2113_v54 = vpop.eup %2112  ;;  %v1594_v12 = vadd.f32 %v2847_v10, %v1558_v17  ;;  %v1524_v52 = vmul.f32 %v2111_v16, %v2806_v2 }
 0x3fa   :  { %v1593_v33 = vadd.f32 %v2847_v10, %v1557_v57  ;;  %v1523_v6 = vmul.f32 %v2113_v54, %v2801_v13 }
 0x3fb   :  { %1626 = vst.msk [vmem:[%s3078_s5 + $0xc8] sm:$0xff] %vm1111_vm2, %v1594_v12  ;;  %v1560_v11 = vmul.f32 %v2845_v63, %v1524_v52 }
 0x3fc   :  { %v2115_v50 = vpop.eup %2114  ;;  %1625 = vst.msk [vmem:[%s3078_s5 + $0xc0] sm:$0xff] %vm1111_vm2, %v1593_v33  ;;  %v1559_v20 = vmul.f32 %v2845_v63, %v1523_v6 }
 0x3fd   :  { %v2117_v2 = vpop.eup %2116  ;;  %v1596_v18 = vadd.f32 %v2847_v10, %v1560_v11  ;;  %v1526_v13 = vmul.f32 %v2115_v50, %v2818_v9 }
 0x3fe   :  { %v1595_v15 = vadd.f32 %v2847_v10, %v1559_v20  ;;  %v1525_v19 = vmul.f32 %v2117_v2, %v2813_v48 }
 0x3ff   :  { %1628 = vst.msk [vmem:[%s3078_s5 + $0xd8] sm:$0xff] %vm1111_vm2, %v1596_v18  ;;  %v1562_v42 = vmul.f32 %v2845_v63, %v1526_v13 }
 0x400   :  { %v2119_v24 = vpop.eup %2118  ;;  %1627 = vst.msk [vmem:[%s3078_s5 + $0xd0] sm:$0xff] %vm1111_vm2, %v1595_v15  ;;  %v1561_v35 = vmul.f32 %v2845_v63, %v1525_v19 }
 0x401   :  { %v2121_v9 = vpop.eup %2120  ;;  %v1598_v30 = vadd.f32 %v2847_v10, %v1562_v42  ;;  %v1528_v48 = vmul.f32 %v2119_v24, %v2830_v44 }
 0x402   :  { %v1597_v25 = vadd.f32 %v2847_v10, %v1561_v35  ;;  %v1527_v1 = vmul.f32 %v2121_v9, %v2825_v5 }
 0x403   :  { %1630 = vst.msk [vmem:[%s3078_s5 + $0xe8] sm:$0xff] %vm1111_vm2, %v1598_v30  ;;  %v1564_v39 = vmul.f32 %v2845_v63, %v1528_v48 }
 0x404   :  { %1629 = vst.msk [vmem:[%s3078_s5 + $0xe0] sm:$0xff] %vm1111_vm2, %v1597_v25  ;;  %v1563_v23 = vmul.f32 %v2845_v63, %v1527_v1 }
 0x405   :  { %v1600_v44 = vadd.f32 %v2847_v10, %v1564_v39 }
 0x406   :  { %v1599_v31 = vadd.f32 %v2847_v10, %v1563_v23 }
 0x407   :  { %1632 = vst.msk [vmem:[%s3078_s5 + $0xf8] sm:$0xff] %vm1111_vm2, %v1600_v44 }
 0x408   :  { %1631 = vst.msk [vmem:[%s3078_s5 + $0xf0] sm:$0xff] %vm1111_vm2, %v1599_v31 }

</bundles_post_ra>
